<compile_context>
chip_gen: v7x
topology: tpu7x:2x2x1
jax: 0.10.0
libtpu: 0.0.40
codegen_flags: <defaults>
</compile_context>

<pallas_src>
import math

import jax
import jax.numpy as jnp
from jax.experimental import pallas as pl
from jax.experimental.pallas import tpu as pltpu


def _round_up(x, m):
    return (x + m - 1) // m * m


# ----------------------------------------------------------------------------
# Pallas kernel: gate-fused bi-GRU over one (batch-tile, time-chunk) grid cell.
#   x_f_ref   : (TC, NB, Cp)  bf16  forward-ordered time chunk of the inputs
#   x_b_ref   : (TC, NB, Cp)  bf16  reversed chunk (chunk index ntc-1-t)
#   mask_*    : (TC, NB, 1)   f32   valid-step mask (slim: 1 lane, not Hp)
#   wih_*     : (Cp, 3Hp)     bf16  gate-fused input weights  [r|z|n]
#   bih_*     : (1, 3Hp)      f32
#   whh_*     : (Hp, 3Hp)     bf16  gate-fused recurrent weights
#   bhh_*     : (1, 3Hp)      f32
#   out_f_ref : (TC, NB, Hp)  f32   forward outputs for this chunk
#   out_b_ref : (TC, NB, Hp)  f32   backward outputs (chunk ntc-1-t)
#   hl_ref    : (NB, 2Hp)     f32   last hidden states (fwd | bwd)
#   ig_*_ref  : (TC, NB, 3Hp) bf16  scratch: precomputed input gates
#   hf/hb_ref : (NB, Hp)      f32   scratch: hidden carried across chunks
# ----------------------------------------------------------------------------
def _bigru_kernel(x_f_ref, x_b_ref, mask_f_ref, mask_b_ref,
                  wih_f_ref, bih_f_ref, whh_f_ref, bhh_f_ref,
                  wih_b_ref, bih_b_ref, whh_b_ref, bhh_b_ref,
                  out_f_ref, out_b_ref, hl_ref,
                  ig_f_ref, ig_b_ref, hf_ref, hb_ref):
    TC, NB, Cp = x_f_ref.shape
    Hp = whh_f_ref.shape[0]
    H3 = 3 * Hp
    t = pl.program_id(1)

    @pl.when(t == 0)
    def _():
        hf_ref[...] = jnp.zeros_like(hf_ref)
        hb_ref[...] = jnp.zeros_like(hb_ref)

    # ---- input projection for this chunk: bulk gate-fused MXU matmuls ----
    pchunk = max(1, min(TC, 512 // NB))
    while TC % pchunk:                 # static: make pchunk divide TC
        pchunk -= 1
    nproj = TC // pchunk
    rows = pchunk * NB
    bih_f = bih_f_ref[...]             # hoisted out of the chunk loop
    bih_b = bih_b_ref[...]

    @pl.loop(0, nproj)
    def _(p):
        t0 = pl.multiple_of(p * pchunk, pchunk)
        xf = x_f_ref[pl.ds(t0, pchunk), :, :].reshape(rows, Cp)
        xb = x_b_ref[pl.ds(t0, pchunk), :, :].reshape(rows, Cp)
        igf = jnp.dot(xf, wih_f_ref[...],
                      preferred_element_type=jnp.float32) + bih_f
        igb = jnp.dot(xb, wih_b_ref[...],
                      preferred_element_type=jnp.float32) + bih_b
        ig_f_ref[pl.ds(t0, pchunk), :, :] = (
            igf.reshape(pchunk, NB, H3).astype(jnp.bfloat16))
        ig_b_ref[pl.ds(t0, pchunk), :, :] = (
            igb.reshape(pchunk, NB, H3).astype(jnp.bfloat16))

    # TODO(synk): software-pipeline the projection one chunk ahead of the
    # recurrence (the MXU is mostly idle on the serial chain below).

    bhh_f = bhh_f_ref[...]             # small (1, 3Hp) hoisted loads; the
    bhh_b = bhh_b_ref[...]             # sublane broadcast fuses into the add.

    def cell(ig_t, h, whh_ref, bhh):
        # PyTorch GRU gate order r, z, n; bhh_n stays inside the r* term.
        # TODO(synk): keep whh MXU-resident via matmul_push_rhs/acc_lhs
        # (one MXU per direction on v5e/v6e) instead of re-streaming per step.
        hg = jnp.dot(h.astype(jnp.bfloat16), whh_ref[...],
                     preferred_element_type=jnp.float32) + bhh
        r = jax.nn.sigmoid(ig_t[:, :Hp] + hg[:, :Hp])
        z = jax.nn.sigmoid(ig_t[:, Hp:2 * Hp] + hg[:, Hp:2 * Hp])
        n = jnp.tanh(ig_t[:, 2 * Hp:] + r * hg[:, 2 * Hp:])
        return (1.0 - z) * n + z * h

    def one_step(i, h_f, h_b):
        # forward chain at local time i
        m_f = mask_f_ref[i, :, :]                        # (NB, 1)
        ig_f = ig_f_ref[i, :, :].astype(jnp.float32)     # (NB, 3Hp)
        hc_f = cell(ig_f, h_f, whh_f_ref, bhh_f)
        h_f = h_f + m_f * (hc_f - h_f)                   # carry through padding
        out_f_ref[i, :, :] = m_f * hc_f                  # zero where padded

        # backward chain at local time TC-1-i (block is the reversed chunk)
        j = TC - 1 - i
        m_b = mask_b_ref[j, :, :]
        ig_b = ig_b_ref[j, :, :].astype(jnp.float32)
        hc_b = cell(ig_b, h_b, whh_b_ref, bhh_b)
        h_b = h_b + m_b * (hc_b - h_b)
        out_b_ref[j, :, :] = m_b * h_b
        return h_f, h_b

    # Manual unroll-by-2 (TC is a multiple of 8): two fwd + two bwd steps of
    # independent work per iteration for the scheduler to overlap.
    # TODO(synk): bound the loop to this tile's true max length via
    # PrefetchScalarGridSpec and skip fully-padded trailing chunks.
    def step(i2, carry):
        h_f, h_b = carry
        i = pl.multiple_of(i2 * 2, 2)
        h_f, h_b = one_step(i, h_f, h_b)
        h_f, h_b = one_step(i + 1, h_f, h_b)
        return (h_f, h_b)

    h_f, h_b = jax.lax.fori_loop(0, TC // 2, step, (hf_ref[...], hb_ref[...]))
    hf_ref[...] = h_f
    hb_ref[...] = h_b

    @pl.when(t == pl.num_programs(1) - 1)
    def _():
        hl_ref[:, pl.ds(0, Hp)] = h_f      # forward hidden at t = length-1
        hl_ref[:, pl.ds(Hp, Hp)] = h_b     # backward hidden at t = 0


# ----------------------------------------------------------------------------
# Parameters (PyTorch-default uniform(-1/sqrt(H), 1/sqrt(H))), gate-major
# layout per direction: W_ih (3, C, H), W_hh (3, H, H), biases (3, H),
# gate order r, z, n (same as torch weight_ih_l0 row blocks).
# ----------------------------------------------------------------------------
def make_gru_params(key, in_channels, hidden_size):
    stdv = 1.0 / math.sqrt(hidden_size)
    ks = jax.random.split(key, 8)

    def u(k, shape):
        return jax.random.uniform(k, shape, jnp.float32, -stdv, stdv)

    return dict(
        wih_f=u(ks[0], (3, in_channels, hidden_size)),
        whh_f=u(ks[1], (3, hidden_size, hidden_size)),
        bih_f=u(ks[2], (3, hidden_size)),
        bhh_f=u(ks[3], (3, hidden_size)),
        wih_b=u(ks[4], (3, in_channels, hidden_size)),
        whh_b=u(ks[5], (3, hidden_size, hidden_size)),
        bih_b=u(ks[6], (3, hidden_size)),
        bhh_b=u(ks[7], (3, hidden_size)),
    )


# ---- wrapper-side weight packing (gate-fused, tile-padded) ------------------
def _fuse_pad_w(w3, rows_pad, hp):
    # w3: (3, R, H) gate-major -> (rows_pad, 3*hp), each gate block zero-padded.
    _, r, h = w3.shape
    wp = jnp.zeros((3, rows_pad, hp), w3.dtype).at[:, :r, :h].set(w3)
    return jnp.transpose(wp, (1, 0, 2)).reshape(rows_pad, 3 * hp)


def _fuse_pad_b(b3, hp):
    # b3: (3, H) -> (1, 3*hp)
    _, h = b3.shape
    bp = jnp.zeros((3, hp), b3.dtype).at[:, :h].set(b3)
    return bp.reshape(1, 3 * hp)


# ----------------------------------------------------------------------------
# Wrapper == RNNEncoder.forward (gru, num_layers=1, bidir=True, apply_mask=True)
# ----------------------------------------------------------------------------
def rnn_encoder_forward(feature, feature_pad_mask, params, *, tmax=None,
                        time_chunk=32, max_batch_tile=128):
    """feature: (N, T, C_in) float32; feature_pad_mask: (N, T) bool."""
    N, T, C = feature.shape
    H = params["whh_f"].shape[-1]

    Hp = _round_up(H, 128)                 # lane-dense hidden
    Cp = _round_up(C, 128)
    Np = _round_up(N, 8)
    NB = min(Np, _round_up(max_batch_tile, 8))   # batch tile (parallel axis)
    Np = _round_up(Np, NB)

    time_chunk = max(8, _round_up(time_chunk, 8))
    TC = min(time_chunk, _round_up(T, 8))        # time chunk (even, mult of 8)
    Tp = _round_up(T, TC)
    ntc = Tp // TC
    H3 = 3 * Hp

    # gate-fused, tile-padded weights (would be pre-packed once in practice)
    wih_f = _fuse_pad_w(params["wih_f"], Cp, Hp).astype(jnp.bfloat16)  # (Cp,3Hp)
    wih_b = _fuse_pad_w(params["wih_b"], Cp, Hp).astype(jnp.bfloat16)
    bih_f = _fuse_pad_b(params["bih_f"], Hp)                            # (1,3Hp)
    bih_b = _fuse_pad_b(params["bih_b"], Hp)
    whh_f = _fuse_pad_w(params["whh_f"], Hp, Hp).astype(jnp.bfloat16)  # (Hp,3Hp)
    whh_b = _fuse_pad_w(params["whh_b"], Hp, Hp).astype(jnp.bfloat16)
    bhh_f = _fuse_pad_b(params["bhh_f"], Hp)
    bhh_b = _fuse_pad_b(params["bhh_b"], Hp)

    # time-major, tile-padded inputs (bf16 once here); slim 1-lane mask
    x_tm = jnp.transpose(feature, (1, 0, 2)).astype(jnp.bfloat16)      # (T,N,C)
    x_full = jnp.zeros((Tp, Np, Cp), jnp.bfloat16).at[:T, :N, :C].set(x_tm)
    m_tm = jnp.transpose(feature_pad_mask.astype(jnp.float32), (1, 0))  # (T,N)
    mask_full = jnp.zeros((Tp, Np, 1), jnp.float32).at[:T, :N, 0].set(m_tm)

    grid = (Np // NB, ntc)

    # VMEM budget: per-chunk double-buffered blocks + weights + scratch.
    need = (2 * 2 * TC * NB * Cp * 2            # x_f / x_b blocks (bf16)
            + 2 * 2 * TC * NB * 1 * 4           # mask blocks
            + 2 * 2 * (Cp + Hp) * H3 * 2        # wih / whh, both directions
            + 2 * 4 * H3 * 4                    # biases
            + 2 * 2 * TC * NB * Hp * 4          # out_f / out_b blocks
            + 2 * NB * 2 * Hp * 4               # hl
            + 2 * TC * NB * H3 * 2              # ig scratch (bf16)
            + 2 * NB * Hp * 4)                  # h carries
    try:
        phys = int(getattr(pltpu.get_tpu_info(), "vmem_capacity_bytes",
                           64 * 1024 * 1024))
    except Exception:  # pragma: no cover - conservative fallback
        phys = 64 * 1024 * 1024
    cap = max(32 * 1024 * 1024, phys - 16 * 1024 * 1024)
    vmem_limit = int(min(cap, max(32 * 1024 * 1024, need + (8 << 20))))

    # TODO(synk): on v7x with a single batch tile, split the fwd/bwd chains
    # across the two TensorCores (extra parallel direction axis).
    out_f, out_b, hl = pl.pallas_call(
        _bigru_kernel,
        out_shape=(jax.ShapeDtypeStruct((Tp, Np, Hp), jnp.float32),
                   jax.ShapeDtypeStruct((Tp, Np, Hp), jnp.float32),
                   jax.ShapeDtypeStruct((Np, 2 * Hp), jnp.float32)),
        grid=grid,
        in_specs=[
            pl.BlockSpec((TC, NB, Cp), lambda b, t: (t, b, 0)),
            pl.BlockSpec((TC, NB, Cp), lambda b, t: (ntc - 1 - t, b, 0)),
            pl.BlockSpec((TC, NB, 1), lambda b, t: (t, b, 0)),
            pl.BlockSpec((TC, NB, 1), lambda b, t: (ntc - 1 - t, b, 0)),
            pl.BlockSpec((Cp, H3), lambda b, t: (0, 0)),
            pl.BlockSpec((1, H3), lambda b, t: (0, 0)),
            pl.BlockSpec((Hp, H3), lambda b, t: (0, 0)),
            pl.BlockSpec((1, H3), lambda b, t: (0, 0)),
            pl.BlockSpec((Cp, H3), lambda b, t: (0, 0)),
            pl.BlockSpec((1, H3), lambda b, t: (0, 0)),
            pl.BlockSpec((Hp, H3), lambda b, t: (0, 0)),
            pl.BlockSpec((1, H3), lambda b, t: (0, 0)),
        ],
        out_specs=(
            pl.BlockSpec((TC, NB, Hp), lambda b, t: (t, b, 0)),
            pl.BlockSpec((TC, NB, Hp), lambda b, t: (ntc - 1 - t, b, 0)),
            pl.BlockSpec((NB, 2 * Hp), lambda b, t: (b, 0)),
        ),
        scratch_shapes=[pltpu.VMEM((TC, NB, H3), jnp.bfloat16),
                        pltpu.VMEM((TC, NB, H3), jnp.bfloat16),
                        pltpu.VMEM((NB, Hp), jnp.float32),
                        pltpu.VMEM((NB, Hp), jnp.float32)],
        compiler_params=pltpu.CompilerParams(
            dimension_semantics=("parallel", "arbitrary"),
            vmem_limit_bytes=vmem_limit),
    )(x_full, x_full, mask_full, mask_full,
      wih_f, bih_f, whh_f, bhh_f, wih_b, bih_b, whh_b, bhh_b)

    # reassemble PyTorch layout: (N, T, 2H) with fwd || bwd
    hidden = jnp.concatenate([out_f[:T, :N, :H], out_b[:T, :N, :H]], axis=-1)
    hidden = jnp.transpose(hidden, (1, 0, 2))                  # (N, T, 2H)

    if tmax is None:
        # Fallback only (host sync, same as PyTorch's lengths-on-CPU step);
        # pass tmax explicitly to keep dispatch fully async / jittable.
        tmax = int(jnp.sum(feature_pad_mask, axis=-1).max())
    hidden_seqs = hidden[:, :tmax, :]                          # pad to Tmax only

    last_hstate = jnp.stack([hl[:N, :H], hl[:N, Hp:Hp + H]], axis=0)  # (2,N,H)
    last_cstate = None                                         # GRU: no cell st.
    return hidden_seqs, last_hstate, last_cstate


# ----------------------------------------------------------------------------
# Pure-JAX f32 reference (correctness sanity check of the kernel)
# ----------------------------------------------------------------------------
def _ref_forward(feature, feature_pad_mask, params):
    N, T, C = feature.shape
    mask = feature_pad_mask.astype(jnp.float32)

    def cell(x_t, h, wih, whh, bih, bhh):
        i_r = x_t @ wih[0] + bih[0]
        i_z = x_t @ wih[1] + bih[1]
        i_n = x_t @ wih[2] + bih[2]
        h_r = h @ whh[0] + bhh[0]
        h_z = h @ whh[1] + bhh[1]
        h_n = h @ whh[2] + bhh[2]
        r = jax.nn.sigmoid(i_r + h_r)
        z = jax.nn.sigmoid(i_z + h_z)
        n = jnp.tanh(i_n + r * h_n)
        return (1.0 - z) * n + z * h

    H = params["whh_f"].shape[-1]
    with jax.default_matmul_precision("highest"):
        h = jnp.zeros((N, H), jnp.float32)
        out_f = []
        for t in range(T):
            m = mask[:, t:t + 1]
            hc = cell(feature[:, t], h, params["wih_f"], params["whh_f"],
                      params["bih_f"], params["bhh_f"])
            out_f.append(m * hc)
            h = m * hc + (1.0 - m) * h
        h_f = h

        h = jnp.zeros((N, H), jnp.float32)
        out_b = [None] * T
        for t in range(T - 1, -1, -1):
            m = mask[:, t:t + 1]
            hc = cell(feature[:, t], h, params["wih_b"], params["whh_b"],
                      params["bih_b"], params["bhh_b"])
            h = m * hc + (1.0 - m) * h
            out_b[t] = m * h
        h_b = h

    hidden = jnp.concatenate(
        [jnp.stack(out_f, axis=1), jnp.stack(out_b, axis=1)], axis=-1)
    tmax = int(feature_pad_mask.sum(axis=-1).max())
    return hidden[:, :tmax, :], jnp.stack([h_f, h_b], axis=0), None


if __name__ == "__main__":
    # Small shapes consistent with the module (batch-first sequences).
    N, T, C_IN, H = 2, 8, 16, 32

    key = jax.random.PRNGKey(0)
    k_feat, _ = jax.random.split(key)
    feature = jax.random.normal(k_feat, (N, T, C_IN), jnp.float32)

    # Variable-length batch: lengths [8, 5] -> feature_pad_mask (N, T) bool.
    lengths = [8, 5]
    feature_pad_mask = (jnp.arange(T)[None, :]
                        < jnp.array(lengths, jnp.int32)[:, None])

    params = make_gru_params(jax.random.PRNGKey(42), C_IN, H)

    tmax = max(lengths)  # host-known -> no device->host sync in the wrapper
    hidden_seqs, last_hstate, last_cstate = rnn_encoder_forward(
        feature, feature_pad_mask, params, tmax=tmax)
    jax.block_until_ready((hidden_seqs, last_hstate))

    # Sanity check against a pure-JAX f32 reference of the same semantics.
    ref_h, ref_last, _ = _ref_forward(feature, feature_pad_mask, params)
    assert hidden_seqs.shape == (N, tmax, 2 * H)
    assert last_hstate.shape == (2, N, H)
    assert last_cstate is None
    # bf16 MXU matmuls + bf16 ig storage vs f32-HIGHEST reference -> loose tol.
    assert jnp.allclose(hidden_seqs, ref_h, atol=5e-2, rtol=5e-2), \
        float(jnp.max(jnp.abs(hidden_seqs - ref_h)))
    assert jnp.allclose(last_hstate, ref_last, atol=5e-2, rtol=5e-2), \
        float(jnp.max(jnp.abs(last_hstate - ref_last)))

    print("KERNEL_OK")
</pallas_src>

<mosaic_0001>
module attributes {stable_mosaic.version = 11 : i64} {
  func.func @_bigru_kernel(%arg0: i32, %arg1: i32, %arg2: memref<8x8x128xbf16, #tpu.memory_space<vmem>>, %arg3: memref<8x8x128xbf16, #tpu.memory_space<vmem>>, %arg4: memref<8x8x1xf32, #tpu.memory_space<vmem>>, %arg5: memref<8x8x1xf32, #tpu.memory_space<vmem>>, %arg6: memref<128x384xbf16, #tpu.memory_space<vmem>>, %arg7: memref<1x384xf32, #tpu.memory_space<vmem>>, %arg8: memref<128x384xbf16, #tpu.memory_space<vmem>>, %arg9: memref<1x384xf32, #tpu.memory_space<vmem>>, %arg10: memref<128x384xbf16, #tpu.memory_space<vmem>>, %arg11: memref<1x384xf32, #tpu.memory_space<vmem>>, %arg12: memref<128x384xbf16, #tpu.memory_space<vmem>>, %arg13: memref<1x384xf32, #tpu.memory_space<vmem>>, %arg14: memref<8x8x128xf32, #tpu.memory_space<vmem>>, %arg15: memref<8x8x128xf32, #tpu.memory_space<vmem>>, %arg16: memref<8x256xf32, #tpu.memory_space<vmem>>, %arg17: memref<8x8x384xbf16, #tpu.memory_space<vmem>>, %arg18: memref<8x8x384xbf16, #tpu.memory_space<vmem>>, %arg19: memref<8x128xf32, #tpu.memory_space<vmem>>, %arg20: memref<8x128xf32, #tpu.memory_space<vmem>>) attributes {dimension_semantics = [#tpu.dimension_semantics<parallel>, #tpu.dimension_semantics<arbitrary>], iteration_bounds = array<i64: 1, 1>, scalar_prefetch = 0 : i64, scratch_operands = 4 : i64, tpu.core_type = #tpu.core_type<tc>, window_params = [{transform_indices = @transform_0, window_bounds = array<i64: 8, 8, 128>}, {transform_indices = @transform_1, window_bounds = array<i64: 8, 8, 128>}, {transform_indices = @transform_2, window_bounds = array<i64: 8, 8, 1>}, {transform_indices = @transform_3, window_bounds = array<i64: 8, 8, 1>}, {pipeline_mode = #tpu.pipeline_mode<synchronous>, transform_indices = @transform_4, window_bounds = array<i64: 128, 384>}, {pipeline_mode = #tpu.pipeline_mode<synchronous>, transform_indices = @transform_5, window_bounds = array<i64: 1, 384>}, {pipeline_mode = #tpu.pipeline_mode<synchronous>, transform_indices = @transform_6, window_bounds = array<i64: 128, 384>}, {pipeline_mode = #tpu.pipeline_mode<synchronous>, transform_indices = @transform_7, window_bounds = array<i64: 1, 384>}, {pipeline_mode = #tpu.pipeline_mode<synchronous>, transform_indices = @transform_8, window_bounds = array<i64: 128, 384>}, {pipeline_mode = #tpu.pipeline_mode<synchronous>, transform_indices = @transform_9, window_bounds = array<i64: 1, 384>}, {pipeline_mode = #tpu.pipeline_mode<synchronous>, transform_indices = @transform_10, window_bounds = array<i64: 128, 384>}, {pipeline_mode = #tpu.pipeline_mode<synchronous>, transform_indices = @transform_11, window_bounds = array<i64: 1, 384>}, {transform_indices = @transform_12, window_bounds = array<i64: 8, 8, 128>}, {transform_indices = @transform_13, window_bounds = array<i64: 8, 8, 128>}, {transform_indices = @transform_14, window_bounds = array<i64: 8, 256>}]} {
    %c0_i32 = arith.constant 0 : i32
    %0 = arith.cmpi eq, %arg1, %c0_i32 : i32
    %1 = arith.extui %0 : i1 to i32
    %c0_i32_0 = arith.constant 0 : i32
    %2 = arith.cmpi ne, %1, %c0_i32_0 : i32
    scf.if %2 {
      %cst_37 = arith.constant 0.000000e+00 : f32
      %42 = vector.broadcast %cst_37 : f32 to vector<8x128xf32>
      %c0_38 = arith.constant 0 : index
      %c0_39 = arith.constant 0 : index
      %43 = vector.load %arg19[%c0_38, %c0_39] : memref<8x128xf32, #tpu.memory_space<vmem>>, vector<8x128xf32>
      tpu.vector_store %arg19[%c0_38, %c0_39], %42 {strides = array<i32>} : memref<8x128xf32, #tpu.memory_space<vmem>>, vector<8x128xf32>,
      %cst_40 = arith.constant 0.000000e+00 : f32
      %44 = vector.broadcast %cst_40 : f32 to vector<8x128xf32>
      %c0_41 = arith.constant 0 : index
      %c0_42 = arith.constant 0 : index
      %45 = vector.load %arg20[%c0_41, %c0_42] : memref<8x128xf32, #tpu.memory_space<vmem>>, vector<8x128xf32>
      tpu.vector_store %arg20[%c0_41, %c0_42], %44 {strides = array<i32>} : memref<8x128xf32, #tpu.memory_space<vmem>>, vector<8x128xf32>,
    } else {
    }
    %c0 = arith.constant 0 : index
    %c0_1 = arith.constant 0 : index
    %3 = vector.load %arg7[%c0, %c0_1] : memref<1x384xf32, #tpu.memory_space<vmem>>, vector<1x384xf32>
    %c0_2 = arith.constant 0 : index
    %c0_3 = arith.constant 0 : index
    %4 = vector.load %arg11[%c0_2, %c0_3] : memref<1x384xf32, #tpu.memory_space<vmem>>, vector<1x384xf32>
    %c0_i32_4 = arith.constant 0 : i32
    %c1_i32 = arith.constant 1 : i32
    %5 = arith.muli %c0_i32_4, %c1_i32 : i32
    %c0_i32_5 = arith.constant 0 : i32
    %6 = arith.addi %c0_i32_5, %5 : i32
    %c8_i32 = arith.constant 8 : i32
    %7 = arith.muli %6, %c8_i32 : i32
    %8 = tpu.assume_multiple %7, 8 : i32
    %9 = arith.index_cast %8 : i32 to index
    %c0_6 = arith.constant 0 : index
    %c0_7 = arith.constant 0 : index
    %10 = vector.load %arg2[%9, %c0_6, %c0_7] : memref<8x8x128xbf16, #tpu.memory_space<vmem>>, vector<8x8x128xbf16>
    %11 = vector.shape_cast %10 : vector<8x8x128xbf16> to vector<64x128xbf16>
    %12 = arith.index_cast %8 : i32 to index
    %c0_8 = arith.constant 0 : index
    %c0_9 = arith.constant 0 : index
    %13 = vector.load %arg3[%12, %c0_8, %c0_9] : memref<8x8x128xbf16, #tpu.memory_space<vmem>>, vector<8x8x128xbf16>
    %14 = vector.shape_cast %13 : vector<8x8x128xbf16> to vector<64x128xbf16>
    %c0_10 = arith.constant 0 : index
    %c0_11 = arith.constant 0 : index
    %15 = vector.load %arg6[%c0_10, %c0_11] : memref<128x384xbf16, #tpu.memory_space<vmem>>, vector<128x384xbf16>
    %cst = arith.constant dense<0.000000e+00> : vector<64x384xf32>
    %16 = tpu.matmul %11, %15, %cst {dimension_numbers = #tpu.dot_dimension_numbers<[1], [0], [0], [1], [0, 0, 1, 1], [], []>} : vector<64x128xbf16>, vector<128x384xbf16>, vector<64x384xf32> -> vector<64x384xf32>
    %17 = vector.broadcast %3 : vector<1x384xf32> to vector<64x384xf32>
    %18 = arith.addf %16, %17 : vector<64x384xf32>
    %c0_12 = arith.constant 0 : index
    %c0_13 = arith.constant 0 : index
    %19 = vector.load %arg10[%c0_12, %c0_13] : memref<128x384xbf16, #tpu.memory_space<vmem>>, vector<128x384xbf16>
    %cst_14 = arith.constant dense<0.000000e+00> : vector<64x384xf32>
    %20 = tpu.matmul %14, %19, %cst_14 {dimension_numbers = #tpu.dot_dimension_numbers<[1], [0], [0], [1], [0, 0, 1, 1], [], []>} : vector<64x128xbf16>, vector<128x384xbf16>, vector<64x384xf32> -> vector<64x384xf32>
    %21 = vector.broadcast %4 : vector<1x384xf32> to vector<64x384xf32>
    %22 = arith.addf %20, %21 : vector<64x384xf32>
    %23 = vector.shape_cast %18 : vector<64x384xf32> to vector<8x8x384xf32>
    %24 = arith.truncf %23 : vector<8x8x384xf32> to vector<8x8x384xbf16>
    %25 = arith.index_cast %8 : i32 to index
    %c0_15 = arith.constant 0 : index
    %c0_16 = arith.constant 0 : index
    %26 = vector.load %arg17[%25, %c0_15, %c0_16] : memref<8x8x384xbf16, #tpu.memory_space<vmem>>, vector<8x8x384xbf16>
    tpu.vector_store %arg17[%25, %c0_15, %c0_16], %24 {strides = array<i32>} : memref<8x8x384xbf16, #tpu.memory_space<vmem>>, vector<8x8x384xbf16>,
    %27 = vector.shape_cast %22 : vector<64x384xf32> to vector<8x8x384xf32>
    %28 = arith.truncf %27 : vector<8x8x384xf32> to vector<8x8x384xbf16>
    %29 = arith.index_cast %8 : i32 to index
    %c0_17 = arith.constant 0 : index
    %c0_18 = arith.constant 0 : index
    %30 = vector.load %arg18[%29, %c0_17, %c0_18] : memref<8x8x384xbf16, #tpu.memory_space<vmem>>, vector<8x8x384xbf16>
    tpu.vector_store %arg18[%29, %c0_17, %c0_18], %28 {strides = array<i32>} : memref<8x8x384xbf16, #tpu.memory_space<vmem>>, vector<8x8x384xbf16>,
    %c1_i32_19 = arith.constant 1 : i32
    %c0_20 = arith.constant 0 : index
    %c0_21 = arith.constant 0 : index
    %31 = vector.load %arg9[%c0_20, %c0_21] : memref<1x384xf32, #tpu.memory_space<vmem>>, vector<1x384xf32>
    %c0_22 = arith.constant 0 : index
    %c0_23 = arith.constant 0 : index
    %32 = vector.load %arg13[%c0_22, %c0_23] : memref<1x384xf32, #tpu.memory_space<vmem>>, vector<1x384xf32>
    %c0_24 = arith.constant 0 : index
    %c0_25 = arith.constant 0 : index
    %33 = vector.load %arg19[%c0_24, %c0_25] : memref<8x128xf32, #tpu.memory_space<vmem>>, vector<8x128xf32>
    %c0_26 = arith.constant 0 : index
    %c0_27 = arith.constant 0 : index
    %34 = vector.load %arg20[%c0_26, %c0_27] : memref<8x128xf32, #tpu.memory_space<vmem>>, vector<8x128xf32>
    %c0_i32_28 = arith.constant 0 : i32
    %c4_i32 = arith.constant 4 : i32
    %35 = arith.addi %c0_i32_28, %c4_i32 : i32
    %c1_i32_29 = arith.constant 1 : i32
    %36:2 = scf.for %arg21 = %c0_i32_28 to %35 step %c1_i32_29 iter_args(%arg22 = %33, %arg23 = %34) -> (vector<8x128xf32>, vector<8x128xf32>)  : i32 {
      %c2_i32 = arith.constant 2 : i32
      %42 = arith.muli %arg21, %c2_i32 : i32
      %43 = tpu.assume_multiple %42, 2 : i32
      %44 = arith.index_cast %43 : i32 to index
      %c0_37 = arith.constant 0 : index
      %c0_38 = arith.constant 0 : index
      %45 = vector.load %arg4[%44, %c0_37, %c0_38] : memref<8x8x1xf32, #tpu.memory_space<vmem>>, vector<1x8x1xf32>
      %46 = vector.shape_cast %45 : vector<1x8x1xf32> to vector<8x1xf32>
      %47 = arith.index_cast %43 : i32 to index
      %c0_39 = arith.constant 0 : index
      %c0_40 = arith.constant 0 : index
      %48 = vector.load %arg17[%47, %c0_39, %c0_40] : memref<8x8x384xbf16, #tpu.memory_space<vmem>>, vector<1x8x384xbf16>
      %49 = vector.shape_cast %48 : vector<1x8x384xbf16> to vector<8x384xbf16>
      %50 = arith.extf %49 : vector<8x384xbf16> to vector<8x384xf32>
      %51 = arith.truncf %arg22 : vector<8x128xf32> to vector<8x128xbf16>
      %c0_41 = arith.constant 0 : index
      %c0_42 = arith.constant 0 : index
      %52 = vector.load %arg8[%c0_41, %c0_42] : memref<128x384xbf16, #tpu.memory_space<vmem>>, vector<128x384xbf16>
      %cst_43 = arith.constant dense<0.000000e+00> : vector<8x384xf32>
      %53 = tpu.matmul %51, %52, %cst_43 {dimension_numbers = #tpu.dot_dimension_numbers<[1], [0], [0], [1], [0, 0, 1, 1], [], []>} : vector<8x128xbf16>, vector<128x384xbf16>, vector<8x384xf32> -> vector<8x384xf32>
      %54 = vector.broadcast %31 : vector<1x384xf32> to vector<8x384xf32>
      %55 = arith.addf %53, %54 : vector<8x384xf32>
      %56 = vector.extract_strided_slice %50 {offsets = [0, 0], sizes = [8, 128], strides = [1, 1]} : vector<8x384xf32> to vector<8x128xf32>
      %57 = vector.extract_strided_slice %55 {offsets = [0, 0], sizes = [8, 128], strides = [1, 1]} : vector<8x384xf32> to vector<8x128xf32>
      %58 = arith.addf %56, %57 : vector<8x128xf32>
      %59 = arith.negf %58 : vector<8x128xf32>
      %60 = math.exp %59 : vector<8x128xf32>
      %cst_44 = arith.constant 1.000000e+00 : f32
      %61 = vector.broadcast %cst_44 : f32 to vector<8x128xf32>
      %62 = arith.addf %61, %60 : vector<8x128xf32>
      %63 = arith.divf %61, %62 : vector<8x128xf32>
      %64 = vector.extract_strided_slice %50 {offsets = [0, 128], sizes = [8, 128], strides = [1, 1]} : vector<8x384xf32> to vector<8x128xf32>
      %65 = vector.extract_strided_slice %55 {offsets = [0, 128], sizes = [8, 128], strides = [1, 1]} : vector<8x384xf32> to vector<8x128xf32>
      %66 = arith.addf %64, %65 : vector<8x128xf32>
      %67 = arith.negf %66 : vector<8x128xf32>
      %68 = math.exp %67 : vector<8x128xf32>
      %cst_45 = arith.constant 1.000000e+00 : f32
      %69 = vector.broadcast %cst_45 : f32 to vector<8x128xf32>
      %70 = arith.addf %69, %68 : vector<8x128xf32>
      %71 = arith.divf %69, %70 : vector<8x128xf32>
      %72 = vector.extract_strided_slice %50 {offsets = [0, 256], sizes = [8, 128], strides = [1, 1]} : vector<8x384xf32> to vector<8x128xf32>
      %73 = vector.extract_strided_slice %55 {offsets = [0, 256], sizes = [8, 128], strides = [1, 1]} : vector<8x384xf32> to vector<8x128xf32>
      %74 = arith.mulf %63, %73 : vector<8x128xf32>
      %75 = arith.addf %72, %74 : vector<8x128xf32>
      %76 = math.tanh %75 : vector<8x128xf32>
      %cst_46 = arith.constant 1.000000e+00 : f32
      %77 = vector.broadcast %cst_46 : f32 to vector<8x128xf32>
      %78 = arith.subf %77, %71 : vector<8x128xf32>
      %79 = arith.mulf %78, %76 : vector<8x128xf32>
      %80 = arith.mulf %71, %arg22 : vector<8x128xf32>
      %81 = arith.addf %79, %80 : vector<8x128xf32>
      %82 = arith.subf %81, %arg22 : vector<8x128xf32>
      %83 = vector.broadcast %46 : vector<8x1xf32> to vector<8x128xf32>
      %84 = arith.mulf %83, %82 : vector<8x128xf32>
      %85 = arith.addf %arg22, %84 : vector<8x128xf32>
      %86 = vector.broadcast %46 : vector<8x1xf32> to vector<8x128xf32>
      %87 = arith.mulf %86, %81 : vector<8x128xf32>
      %88 = arith.index_cast %43 : i32 to index
      %c0_47 = arith.constant 0 : index
      %c0_48 = arith.constant 0 : index
      %89 = vector.load %arg14[%88, %c0_47, %c0_48] : memref<8x8x128xf32, #tpu.memory_space<vmem>>, vector<1x8x128xf32>
      %90 = vector.shape_cast %89 : vector<1x8x128xf32> to vector<8x128xf32>
      %91 = vector.shape_cast %87 : vector<8x128xf32> to vector<1x8x128xf32>
      tpu.vector_store %arg14[%88, %c0_47, %c0_48], %91 {strides = array<i32>} : memref<8x8x128xf32, #tpu.memory_space<vmem>>, vector<1x8x128xf32>,
      %c7_i32 = arith.constant 7 : i32
      %92 = arith.subi %c7_i32, %43 : i32
      %93 = arith.index_cast %92 : i32 to index
      %c0_49 = arith.constant 0 : index
      %c0_50 = arith.constant 0 : index
      %94 = vector.load %arg5[%93, %c0_49, %c0_50] : memref<8x8x1xf32, #tpu.memory_space<vmem>>, vector<1x8x1xf32>
      %95 = vector.shape_cast %94 : vector<1x8x1xf32> to vector<8x1xf32>
      %96 = arith.index_cast %92 : i32 to index
      %c0_51 = arith.constant 0 : index
      %c0_52 = arith.constant 0 : index
      %97 = vector.load %arg18[%96, %c0_51, %c0_52] : memref<8x8x384xbf16, #tpu.memory_space<vmem>>, vector<1x8x384xbf16>
      %98 = vector.shape_cast %97 : vector<1x8x384xbf16> to vector<8x384xbf16>
      %99 = arith.extf %98 : vector<8x384xbf16> to vector<8x384xf32>
      %100 = arith.truncf %arg23 : vector<8x128xf32> to vector<8x128xbf16>
      %c0_53 = arith.constant 0 : index
      %c0_54 = arith.constant 0 : index
      %101 = vector.load %arg12[%c0_53, %c0_54] : memref<128x384xbf16, #tpu.memory_space<vmem>>, vector<128x384xbf16>
      %cst_55 = arith.constant dense<0.000000e+00> : vector<8x384xf32>
      %102 = tpu.matmul %100, %101, %cst_55 {dimension_numbers = #tpu.dot_dimension_numbers<[1], [0], [0], [1], [0, 0, 1, 1], [], []>} : vector<8x128xbf16>, vector<128x384xbf16>, vector<8x384xf32> -> vector<8x384xf32>
      %103 = vector.broadcast %32 : vector<1x384xf32> to vector<8x384xf32>
      %104 = arith.addf %102, %103 : vector<8x384xf32>
      %105 = vector.extract_strided_slice %99 {offsets = [0, 0], sizes = [8, 128], strides = [1, 1]} : vector<8x384xf32> to vector<8x128xf32>
      %106 = vector.extract_strided_slice %104 {offsets = [0, 0], sizes = [8, 128], strides = [1, 1]} : vector<8x384xf32> to vector<8x128xf32>
      %107 = arith.addf %105, %106 : vector<8x128xf32>
      %108 = arith.negf %107 : vector<8x128xf32>
      %109 = math.exp %108 : vector<8x128xf32>
      %cst_56 = arith.constant 1.000000e+00 : f32
      %110 = vector.broadcast %cst_56 : f32 to vector<8x128xf32>
      %111 = arith.addf %110, %109 : vector<8x128xf32>
      %112 = arith.divf %110, %111 : vector<8x128xf32>
      %113 = vector.extract_strided_slice %99 {offsets = [0, 128], sizes = [8, 128], strides = [1, 1]} : vector<8x384xf32> to vector<8x128xf32>
      %114 = vector.extract_strided_slice %104 {offsets = [0, 128], sizes = [8, 128], strides = [1, 1]} : vector<8x384xf32> to vector<8x128xf32>
      %115 = arith.addf %113, %114 : vector<8x128xf32>
      %116 = arith.negf %115 : vector<8x128xf32>
      %117 = math.exp %116 : vector<8x128xf32>
      %cst_57 = arith.constant 1.000000e+00 : f32
      %118 = vector.broadcast %cst_57 : f32 to vector<8x128xf32>
      %119 = arith.addf %118, %117 : vector<8x128xf32>
      %120 = arith.divf %118, %119 : vector<8x128xf32>
      %121 = vector.extract_strided_slice %99 {offsets = [0, 256], sizes = [8, 128], strides = [1, 1]} : vector<8x384xf32> to vector<8x128xf32>
      %122 = vector.extract_strided_slice %104 {offsets = [0, 256], sizes = [8, 128], strides = [1, 1]} : vector<8x384xf32> to vector<8x128xf32>
      %123 = arith.mulf %112, %122 : vector<8x128xf32>
      %124 = arith.addf %121, %123 : vector<8x128xf32>
      %125 = math.tanh %124 : vector<8x128xf32>
      %cst_58 = arith.constant 1.000000e+00 : f32
      %126 = vector.broadcast %cst_58 : f32 to vector<8x128xf32>
      %127 = arith.subf %126, %120 : vector<8x128xf32>
      %128 = arith.mulf %127, %125 : vector<8x128xf32>
      %129 = arith.mulf %120, %arg23 : vector<8x128xf32>
      %130 = arith.addf %128, %129 : vector<8x128xf32>
      %131 = arith.subf %130, %arg23 : vector<8x128xf32>
      %132 = vector.broadcast %95 : vector<8x1xf32> to vector<8x128xf32>
      %133 = arith.mulf %132, %131 : vector<8x128xf32>
      %134 = arith.addf %arg23, %133 : vector<8x128xf32>
      %135 = vector.broadcast %95 : vector<8x1xf32> to vector<8x128xf32>
      %136 = arith.mulf %135, %134 : vector<8x128xf32>
      %137 = arith.index_cast %92 : i32 to index
      %c0_59 = arith.constant 0 : index
      %c0_60 = arith.constant 0 : index
      %138 = vector.load %arg15[%137, %c0_59, %c0_60] : memref<8x8x128xf32, #tpu.memory_space<vmem>>, vector<1x8x128xf32>
      %139 = vector.shape_cast %138 : vector<1x8x128xf32> to vector<8x128xf32>
      %140 = vector.shape_cast %136 : vector<8x128xf32> to vector<1x8x128xf32>
      tpu.vector_store %arg15[%137, %c0_59, %c0_60], %140 {strides = array<i32>} : memref<8x8x128xf32, #tpu.memory_space<vmem>>, vector<1x8x128xf32>,
      %c1_i32_61 = arith.constant 1 : i32
      %141 = arith.addi %43, %c1_i32_61 : i32
      %142 = arith.index_cast %141 : i32 to index
      %c0_62 = arith.constant 0 : index
      %c0_63 = arith.constant 0 : index
      %143 = vector.load %arg4[%142, %c0_62, %c0_63] : memref<8x8x1xf32, #tpu.memory_space<vmem>>, vector<1x8x1xf32>
      %144 = vector.shape_cast %143 : vector<1x8x1xf32> to vector<8x1xf32>
      %145 = arith.index_cast %141 : i32 to index
      %c0_64 = arith.constant 0 : index
      %c0_65 = arith.constant 0 : index
      %146 = vector.load %arg17[%145, %c0_64, %c0_65] : memref<8x8x384xbf16, #tpu.memory_space<vmem>>, vector<1x8x384xbf16>
      %147 = vector.shape_cast %146 : vector<1x8x384xbf16> to vector<8x384xbf16>
      %148 = arith.extf %147 : vector<8x384xbf16> to vector<8x384xf32>
      %149 = arith.truncf %85 : vector<8x128xf32> to vector<8x128xbf16>
      %c0_66 = arith.constant 0 : index
      %c0_67 = arith.constant 0 : index
      %150 = vector.load %arg8[%c0_66, %c0_67] : memref<128x384xbf16, #tpu.memory_space<vmem>>, vector<128x384xbf16>
      %cst_68 = arith.constant dense<0.000000e+00> : vector<8x384xf32>
      %151 = tpu.matmul %149, %150, %cst_68 {dimension_numbers = #tpu.dot_dimension_numbers<[1], [0], [0], [1], [0, 0, 1, 1], [], []>} : vector<8x128xbf16>, vector<128x384xbf16>, vector<8x384xf32> -> vector<8x384xf32>
      %152 = vector.broadcast %31 : vector<1x384xf32> to vector<8x384xf32>
      %153 = arith.addf %151, %152 : vector<8x384xf32>
      %154 = vector.extract_strided_slice %148 {offsets = [0, 0], sizes = [8, 128], strides = [1, 1]} : vector<8x384xf32> to vector<8x128xf32>
      %155 = vector.extract_strided_slice %153 {offsets = [0, 0], sizes = [8, 128], strides = [1, 1]} : vector<8x384xf32> to vector<8x128xf32>
      %156 = arith.addf %154, %155 : vector<8x128xf32>
      %157 = arith.negf %156 : vector<8x128xf32>
      %158 = math.exp %157 : vector<8x128xf32>
      %cst_69 = arith.constant 1.000000e+00 : f32
      %159 = vector.broadcast %cst_69 : f32 to vector<8x128xf32>
      %160 = arith.addf %159, %158 : vector<8x128xf32>
      %161 = arith.divf %159, %160 : vector<8x128xf32>
      %162 = vector.extract_strided_slice %148 {offsets = [0, 128], sizes = [8, 128], strides = [1, 1]} : vector<8x384xf32> to vector<8x128xf32>
      %163 = vector.extract_strided_slice %153 {offsets = [0, 128], sizes = [8, 128], strides = [1, 1]} : vector<8x384xf32> to vector<8x128xf32>
      %164 = arith.addf %162, %163 : vector<8x128xf32>
      %165 = arith.negf %164 : vector<8x128xf32>
      %166 = math.exp %165 : vector<8x128xf32>
      %cst_70 = arith.constant 1.000000e+00 : f32
      %167 = vector.broadcast %cst_70 : f32 to vector<8x128xf32>
      %168 = arith.addf %167, %166 : vector<8x128xf32>
      %169 = arith.divf %167, %168 : vector<8x128xf32>
      %170 = vector.extract_strided_slice %148 {offsets = [0, 256], sizes = [8, 128], strides = [1, 1]} : vector<8x384xf32> to vector<8x128xf32>
      %171 = vector.extract_strided_slice %153 {offsets = [0, 256], sizes = [8, 128], strides = [1, 1]} : vector<8x384xf32> to vector<8x128xf32>
      %172 = arith.mulf %161, %171 : vector<8x128xf32>
      %173 = arith.addf %170, %172 : vector<8x128xf32>
      %174 = math.tanh %173 : vector<8x128xf32>
      %cst_71 = arith.constant 1.000000e+00 : f32
      %175 = vector.broadcast %cst_71 : f32 to vector<8x128xf32>
      %176 = arith.subf %175, %169 : vector<8x128xf32>
      %177 = arith.mulf %176, %174 : vector<8x128xf32>
      %178 = arith.mulf %169, %85 : vector<8x128xf32>
      %179 = arith.addf %177, %178 : vector<8x128xf32>
      %180 = arith.subf %179, %85 : vector<8x128xf32>
      %181 = vector.broadcast %144 : vector<8x1xf32> to vector<8x128xf32>
      %182 = arith.mulf %181, %180 : vector<8x128xf32>
      %183 = arith.addf %85, %182 : vector<8x128xf32>
      %184 = vector.broadcast %144 : vector<8x1xf32> to vector<8x128xf32>
      %185 = arith.mulf %184, %179 : vector<8x128xf32>
      %186 = arith.index_cast %141 : i32 to index
      %c0_72 = arith.constant 0 : index
      %c0_73 = arith.constant 0 : index
      %187 = vector.load %arg14[%186, %c0_72, %c0_73] : memref<8x8x128xf32, #tpu.memory_space<vmem>>, vector<1x8x128xf32>
      %188 = vector.shape_cast %187 : vector<1x8x128xf32> to vector<8x128xf32>
      %189 = vector.shape_cast %185 : vector<8x128xf32> to vector<1x8x128xf32>
      tpu.vector_store %arg14[%186, %c0_72, %c0_73], %189 {strides = array<i32>} : memref<8x8x128xf32, #tpu.memory_space<vmem>>, vector<1x8x128xf32>,
      %c7_i32_74 = arith.constant 7 : i32
      %190 = arith.subi %c7_i32_74, %141 : i32
      %191 = arith.index_cast %190 : i32 to index
      %c0_75 = arith.constant 0 : index
      %c0_76 = arith.constant 0 : index
      %192 = vector.load %arg5[%191, %c0_75, %c0_76] : memref<8x8x1xf32, #tpu.memory_space<vmem>>, vector<1x8x1xf32>
      %193 = vector.shape_cast %192 : vector<1x8x1xf32> to vector<8x1xf32>
      %194 = arith.index_cast %190 : i32 to index
      %c0_77 = arith.constant 0 : index
      %c0_78 = arith.constant 0 : index
      %195 = vector.load %arg18[%194, %c0_77, %c0_78] : memref<8x8x384xbf16, #tpu.memory_space<vmem>>, vector<1x8x384xbf16>
      %196 = vector.shape_cast %195 : vector<1x8x384xbf16> to vector<8x384xbf16>
      %197 = arith.extf %196 : vector<8x384xbf16> to vector<8x384xf32>
      %198 = arith.truncf %134 : vector<8x128xf32> to vector<8x128xbf16>
      %c0_79 = arith.constant 0 : index
      %c0_80 = arith.constant 0 : index
      %199 = vector.load %arg12[%c0_79, %c0_80] : memref<128x384xbf16, #tpu.memory_space<vmem>>, vector<128x384xbf16>
      %cst_81 = arith.constant dense<0.000000e+00> : vector<8x384xf32>
      %200 = tpu.matmul %198, %199, %cst_81 {dimension_numbers = #tpu.dot_dimension_numbers<[1], [0], [0], [1], [0, 0, 1, 1], [], []>} : vector<8x128xbf16>, vector<128x384xbf16>, vector<8x384xf32> -> vector<8x384xf32>
      %201 = vector.broadcast %32 : vector<1x384xf32> to vector<8x384xf32>
      %202 = arith.addf %200, %201 : vector<8x384xf32>
      %203 = vector.extract_strided_slice %197 {offsets = [0, 0], sizes = [8, 128], strides = [1, 1]} : vector<8x384xf32> to vector<8x128xf32>
      %204 = vector.extract_strided_slice %202 {offsets = [0, 0], sizes = [8, 128], strides = [1, 1]} : vector<8x384xf32> to vector<8x128xf32>
      %205 = arith.addf %203, %204 : vector<8x128xf32>
      %206 = arith.negf %205 : vector<8x128xf32>
      %207 = math.exp %206 : vector<8x128xf32>
      %cst_82 = arith.constant 1.000000e+00 : f32
      %208 = vector.broadcast %cst_82 : f32 to vector<8x128xf32>
      %209 = arith.addf %208, %207 : vector<8x128xf32>
      %210 = arith.divf %208, %209 : vector<8x128xf32>
      %211 = vector.extract_strided_slice %197 {offsets = [0, 128], sizes = [8, 128], strides = [1, 1]} : vector<8x384xf32> to vector<8x128xf32>
      %212 = vector.extract_strided_slice %202 {offsets = [0, 128], sizes = [8, 128], strides = [1, 1]} : vector<8x384xf32> to vector<8x128xf32>
      %213 = arith.addf %211, %212 : vector<8x128xf32>
      %214 = arith.negf %213 : vector<8x128xf32>
      %215 = math.exp %214 : vector<8x128xf32>
      %cst_83 = arith.constant 1.000000e+00 : f32
      %216 = vector.broadcast %cst_83 : f32 to vector<8x128xf32>
      %217 = arith.addf %216, %215 : vector<8x128xf32>
      %218 = arith.divf %216, %217 : vector<8x128xf32>
      %219 = vector.extract_strided_slice %197 {offsets = [0, 256], sizes = [8, 128], strides = [1, 1]} : vector<8x384xf32> to vector<8x128xf32>
      %220 = vector.extract_strided_slice %202 {offsets = [0, 256], sizes = [8, 128], strides = [1, 1]} : vector<8x384xf32> to vector<8x128xf32>
      %221 = arith.mulf %210, %220 : vector<8x128xf32>
      %222 = arith.addf %219, %221 : vector<8x128xf32>
      %223 = math.tanh %222 : vector<8x128xf32>
      %cst_84 = arith.constant 1.000000e+00 : f32
      %224 = vector.broadcast %cst_84 : f32 to vector<8x128xf32>
      %225 = arith.subf %224, %218 : vector<8x128xf32>
      %226 = arith.mulf %225, %223 : vector<8x128xf32>
      %227 = arith.mulf %218, %134 : vector<8x128xf32>
      %228 = arith.addf %226, %227 : vector<8x128xf32>
      %229 = arith.subf %228, %134 : vector<8x128xf32>
      %230 = vector.broadcast %193 : vector<8x1xf32> to vector<8x128xf32>
      %231 = arith.mulf %230, %229 : vector<8x128xf32>
      %232 = arith.addf %134, %231 : vector<8x128xf32>
      %233 = vector.broadcast %193 : vector<8x1xf32> to vector<8x128xf32>
      %234 = arith.mulf %233, %232 : vector<8x128xf32>
      %235 = arith.index_cast %190 : i32 to index
      %c0_85 = arith.constant 0 : index
      %c0_86 = arith.constant 0 : index
      %236 = vector.load %arg15[%235, %c0_85, %c0_86] : memref<8x8x128xf32, #tpu.memory_space<vmem>>, vector<1x8x128xf32>
      %237 = vector.shape_cast %236 : vector<1x8x128xf32> to vector<8x128xf32>
      %238 = vector.shape_cast %234 : vector<8x128xf32> to vector<1x8x128xf32>
      tpu.vector_store %arg15[%235, %c0_85, %c0_86], %238 {strides = array<i32>} : memref<8x8x128xf32, #tpu.memory_space<vmem>>, vector<1x8x128xf32>,
      scf.yield %183, %232 : vector<8x128xf32>, vector<8x128xf32>
    }
    %c4_i32_30 = arith.constant 4 : i32
    %c0_31 = arith.constant 0 : index
    %c0_32 = arith.constant 0 : index
    %37 = vector.load %arg19[%c0_31, %c0_32] : memref<8x128xf32, #tpu.memory_space<vmem>>, vector<8x128xf32>
    tpu.vector_store %arg19[%c0_31, %c0_32], %36#0 {strides = array<i32>} : memref<8x128xf32, #tpu.memory_space<vmem>>, vector<8x128xf32>,
    %c0_33 = arith.constant 0 : index
    %c0_34 = arith.constant 0 : index
    %38 = vector.load %arg20[%c0_33, %c0_34] : memref<8x128xf32, #tpu.memory_space<vmem>>, vector<8x128xf32>
    tpu.vector_store %arg20[%c0_33, %c0_34], %36#1 {strides = array<i32>} : memref<8x128xf32, #tpu.memory_space<vmem>>, vector<8x128xf32>,
    %c0_i32_35 = arith.constant 0 : i32
    %39 = arith.cmpi eq, %arg1, %c0_i32_35 : i32
    %40 = arith.extui %39 : i1 to i32
    %c0_i32_36 = arith.constant 0 : i32
    %41 = arith.cmpi ne, %40, %c0_i32_36 : i32
    scf.if %41 {
      %c0_37 = arith.constant 0 : index
      %c0_38 = arith.constant 0 : index
      %42 = vector.load %arg16[%c0_37, %c0_38] : memref<8x256xf32, #tpu.memory_space<vmem>>, vector<8x128xf32>
      tpu.vector_store %arg16[%c0_37, %c0_38], %36#0 {strides = array<i32>} : memref<8x256xf32, #tpu.memory_space<vmem>>, vector<8x128xf32>,
      %c0_39 = arith.constant 0 : index
      %c128 = arith.constant 128 : index
      %43 = vector.load %arg16[%c0_39, %c128] : memref<8x256xf32, #tpu.memory_space<vmem>>, vector<8x128xf32>
      tpu.vector_store %arg16[%c0_39, %c128], %36#1 {strides = array<i32>} : memref<8x256xf32, #tpu.memory_space<vmem>>, vector<8x128xf32>,
    } else {
    }
    return
  }
  func.func @transform_0(%arg0: i32, %arg1: i32) -> (i32, i32, i32) {
    %c0_i32 = arith.constant 0 : i32
    %c0_i32_0 = arith.constant 0 : i32
    return %arg1, %arg0, %c0_i32 : i32, i32, i32
  }
  func.func @transform_1(%arg0: i32, %arg1: i32) -> (i32, i32, i32) {
    %c0_i32 = arith.constant 0 : i32
    %0 = arith.subi %c0_i32, %arg1 : i32
    %c0_i32_0 = arith.constant 0 : i32
    %c0_i32_1 = arith.constant 0 : i32
    return %0, %arg0, %c0_i32_0 : i32, i32, i32
  }
  func.func @transform_2(%arg0: i32, %arg1: i32) -> (i32, i32, i32) {
    %c0_i32 = arith.constant 0 : i32
    %c0_i32_0 = arith.constant 0 : i32
    return %arg1, %arg0, %c0_i32 : i32, i32, i32
  }
  func.func @transform_3(%arg0: i32, %arg1: i32) -> (i32, i32, i32) {
    %c0_i32 = arith.constant 0 : i32
    %0 = arith.subi %c0_i32, %arg1 : i32
    %c0_i32_0 = arith.constant 0 : i32
    %c0_i32_1 = arith.constant 0 : i32
    return %0, %arg0, %c0_i32_0 : i32, i32, i32
  }
  func.func @transform_4(%arg0: i32, %arg1: i32) -> (i32, i32) {
    %c0_i32 = arith.constant 0 : i32
    %c0_i32_0 = arith.constant 0 : i32
    %c0_i32_1 = arith.constant 0 : i32
    return %c0_i32, %c0_i32_0 : i32, i32
  }
  func.func @transform_5(%arg0: i32, %arg1: i32) -> (i32, i32) {
    %c0_i32 = arith.constant 0 : i32
    %c0_i32_0 = arith.constant 0 : i32
    %c0_i32_1 = arith.constant 0 : i32
    return %c0_i32, %c0_i32_0 : i32, i32
  }
  func.func @transform_6(%arg0: i32, %arg1: i32) -> (i32, i32) {
    %c0_i32 = arith.constant 0 : i32
    %c0_i32_0 = arith.constant 0 : i32
    %c0_i32_1 = arith.constant 0 : i32
    return %c0_i32, %c0_i32_0 : i32, i32
  }
  func.func @transform_7(%arg0: i32, %arg1: i32) -> (i32, i32) {
    %c0_i32 = arith.constant 0 : i32
    %c0_i32_0 = arith.constant 0 : i32
    %c0_i32_1 = arith.constant 0 : i32
    return %c0_i32, %c0_i32_0 : i32, i32
  }
  func.func @transform_8(%arg0: i32, %arg1: i32) -> (i32, i32) {
    %c0_i32 = arith.constant 0 : i32
    %c0_i32_0 = arith.constant 0 : i32
    %c0_i32_1 = arith.constant 0 : i32
    return %c0_i32, %c0_i32_0 : i32, i32
  }
  func.func @transform_9(%arg0: i32, %arg1: i32) -> (i32, i32) {
    %c0_i32 = arith.constant 0 : i32
    %c0_i32_0 = arith.constant 0 : i32
    %c0_i32_1 = arith.constant 0 : i32
    return %c0_i32, %c0_i32_0 : i32, i32
  }
  func.func @transform_10(%arg0: i32, %arg1: i32) -> (i32, i32) {
    %c0_i32 = arith.constant 0 : i32
    %c0_i32_0 = arith.constant 0 : i32
    %c0_i32_1 = arith.constant 0 : i32
    return %c0_i32, %c0_i32_0 : i32, i32
  }
  func.func @transform_11(%arg0: i32, %arg1: i32) -> (i32, i32) {
    %c0_i32 = arith.constant 0 : i32
    %c0_i32_0 = arith.constant 0 : i32
    %c0_i32_1 = arith.constant 0 : i32
    return %c0_i32, %c0_i32_0 : i32, i32
  }
  func.func @transform_12(%arg0: i32, %arg1: i32) -> (i32, i32, i32) {
    %c0_i32 = arith.constant 0 : i32
    %c0_i32_0 = arith.constant 0 : i32
    return %arg1, %arg0, %c0_i32 : i32, i32, i32
  }
  func.func @transform_13(%arg0: i32, %arg1: i32) -> (i32, i32, i32) {
    %c0_i32 = arith.constant 0 : i32
    %0 = arith.subi %c0_i32, %arg1 : i32
    %c0_i32_0 = arith.constant 0 : i32
    %c0_i32_1 = arith.constant 0 : i32
    return %0, %arg0, %c0_i32_0 : i32, i32, i32
  }
  func.func @transform_14(%arg0: i32, %arg1: i32) -> (i32, i32) {
    %c0_i32 = arith.constant 0 : i32
    %c0_i32_0 = arith.constant 0 : i32
    return %arg0, %c0_i32 : i32, i32
  }
}

</mosaic_0001>

<bundles_post_ra>
// kernel: tpu_custom_call.1
= control target key start
LH: loop header
LB: loop body
LE: loop exit
PB: predicated region body
PF: predicated region fallthrough
CT: control target
= control target key end

     0   :  { %20 = vsyncpa [#allocation7], 0  ;;  %s3878_s0 = inlined_call_operand.vmem [shape: bf16[8,8,128], index: 0, kind: input, shape index: {}]   ;;  %s3879_s1 = inlined_call_operand.vmem [shape: bf16[8,8,128], index: 1, kind: input, shape index: {}]   ;;  %s3880_s2 = inlined_call_operand.vmem [shape: f32[8,8,1], index: 2, kind: input, shape index: {}]   ;;  %s3881_s3 = inlined_call_operand.vmem [shape: f32[8,8,1], index: 3, kind: input, shape index: {}]   ;;  %s3882_s4 = inlined_call_operand.hbm [shape: bf16[128,384], index: 4, kind: input, shape index: {}]   ;;  %s3883_s5 = inlined_call_operand.vmem [shape: f32[1,384], index: 5, kind: input, shape index: {}]   ;;  %s3884_s6 = inlined_call_operand.hbm [shape: bf16[128,384], index: 6, kind: input, shape index: {}]   ;;  %s3885_s7 = inlined_call_operand.vmem [shape: f32[1,384], index: 7, kind: input, shape index: {}]   ;;  %s3886_s8 = inlined_call_operand.hbm [shape: bf16[128,384], index: 8, kind: input, shape index: {}]   ;;  %s3887_s9 = inlined_call_operand.vmem [shape: f32[1,384], index: 9, kind: input, shape index: {}]   ;;  %s3888_s10 = inlined_call_operand.hbm [shape: bf16[128,384], index: 10, kind: input, shape index: {}]   ;;  %s3889_s11 = inlined_call_operand.vmem [shape: f32[1,384], index: 11, kind: input, shape index: {}]   ;;  %s3890_s12 = inlined_call_operand.hbm [shape: f32[8,8,128], index: 12, kind: output, shape index: {0}]   ;;  %s3891_s13 = inlined_call_operand.hbm [shape: f32[8,8,128], index: 13, kind: output, shape index: {1}]   ;;  %s3892_s14 = inlined_call_operand.hbm [shape: f32[8,256], index: 14, kind: output, shape index: {2}]  }
   0x1   :  { %21 = vsyncpa [#allocation10], 0 }
   0x2   :  { %22 = vsyncpa [#allocation13], 0 }
   0x3   :  { %23 = vsyncpa [#allocation8], 0 }
   0x4   :  { %24 = vsyncpa [#allocation16], 0  ;;  %s3253_s29 = smov [#allocation9]   ;;  %s3254_s15 = smov [#allocation6]  }
   0x5   :  { %s68_s30 = sshll.u32 %s3253_s29, 4  ;;  %s54_s16 = sshll.u32 %s3254_s15, 4  ;;  %s69_s30 = int_to_ptr.vmem [resolvable:$true] %s68_s30  ;;  %s3343_s16 = int_to_ptr.vmem [resolvable:$true] %s54_s16 }
   0x6   :  { %s3065_s19 = scalar_lea.hbm %s3884_s6, 3072 }
   0x7   :  { %p3066_p0 = scmp.ne.s32.totalorder %s3884_s6, %s3065_s19  ;;  %p3069_p1 = scmp.lt.u32.totalorder %s3065_s19, %s3884_s6 }
   0x9   :  { %p3071_p2 = pnand %p3069_p1, %p3066_p0 }
   0xb   :  { %3074 = shalt.err (!%p3071_p2)
}
   0xc   :  { %s3075_s24 = scalar_lea.vmem %s69_s30, 3072  ;;  %p3080_p4 = scmp.lt.s32.totalorder %s69_s30, %s69_s30 }
   0xd   :  { %p3076_p3 = scmp.ne.s32.totalorder %s69_s30, %s3075_s24  ;;  %p3081_p5 = scmp.lt.s32.totalorder %s3075_s24, %s3075_s24 }
   0xf   :  { %p3082_p6 = por %p3081_p5, %p3080_p4 }
  0x11   :  { %p3083_p7 = pnand %p3082_p6, %p3076_p3 }
  0x13   :  { %3086 = shalt.err (!%p3083_p7)
}
  0x14   :  { %s3255_s25 = smov 192   ;;  %s3256_s26 = smov 12  }
  0x15   :  { %74 = dma.hbm_to_vmem [thread:$0]  %s3884_s6, 3072, %s69_s30, [#allocation10], %s3255_s25, %s3255_s25, %s3256_s26  }
  0x16   :  { %s3087_s17 = scalar_lea.hbm %s3882_s4, 3072 }
  0x17   :  { %p3088_p8 = scmp.ne.s32.totalorder %s3882_s4, %s3087_s17  ;;  %p3091_p9 = scmp.lt.u32.totalorder %s3087_s17, %s3882_s4 }
  0x19   :  { %p3093_p10 = pnand %p3091_p9, %p3088_p8 }
  0x1b   :  { %3096 = shalt.err (!%p3093_p10)
}
  0x1c   :  { %s3097_s22 = scalar_lea.vmem %s3343_s16, 3072  ;;  %p3102_p12 = scmp.lt.s32.totalorder %s3343_s16, %s3343_s16 }
  0x1d   :  { %p3098_p11 = scmp.ne.s32.totalorder %s3343_s16, %s3097_s22  ;;  %p3103_p13 = scmp.lt.s32.totalorder %s3097_s22, %s3097_s22 }
  0x1f   :  { %p3104_p0 = por %p3103_p13, %p3102_p12 }
  0x21   :  { %p3105_p1 = pnand %p3104_p0, %p3098_p11 }
  0x23   :  { %3108 = shalt.err (!%p3105_p1)
}
  0x24   :  { %60 = dma.hbm_to_vmem [thread:$0]  %s3882_s4, 3072, %s3343_s16, [#allocation7], %s3255_s25, %s3255_s25, %s3256_s26  }
  0x25   :  { %s3257_s23 = smov [#allocation11]   ;;  %s3258_s27 = smov [#allocation12]  }
  0x26   :  { %s82_s24 = sshll.u32 %s3257_s23, 4  ;;  %s96_s28 = sshll.u32 %s3258_s27, 4  ;;  %s83_s24 = int_to_ptr.vmem [resolvable:$true] %s82_s24  ;;  %s3380_s28 = int_to_ptr.vmem [resolvable:$true] %s96_s28 }
  0x27   :  { %s3109_s17 = scalar_lea.hbm %s3886_s8, 3072 }
  0x28   :  { %p3110_p2 = scmp.ne.s32.totalorder %s3886_s8, %s3109_s17  ;;  %p3113_p3 = scmp.lt.u32.totalorder %s3109_s17, %s3886_s8 }
  0x2a   :  { %p3115_p4 = pnand %p3113_p3, %p3110_p2 }
  0x2c   :  { %3118 = shalt.err (!%p3115_p4)
}
  0x2d   :  { %s3119_s4 = scalar_lea.vmem %s83_s24, 3072  ;;  %p3124_p6 = scmp.lt.s32.totalorder %s83_s24, %s83_s24 }
  0x2e   :  { %p3120_p5 = scmp.ne.s32.totalorder %s83_s24, %s3119_s4  ;;  %p3125_p7 = scmp.lt.s32.totalorder %s3119_s4, %s3119_s4 }
  0x30   :  { %p3126_p8 = por %p3125_p7, %p3124_p6 }
  0x32   :  { %p3127_p9 = pnand %p3126_p8, %p3120_p5 }
  0x34   :  { %3130 = shalt.err (!%p3127_p9)
}
  0x35   :  { %88 = dma.hbm_to_vmem [thread:$0]  %s3886_s8, 3072, %s83_s24, [#allocation10], %s3255_s25, %s3255_s25, %s3256_s26  }
  0x36   :  { %s3131_s23 = scalar_lea.hbm %s3888_s10, 3072 }
  0x37   :  { %p3132_p10 = scmp.ne.s32.totalorder %s3888_s10, %s3131_s23  ;;  %p3135_p11 = scmp.lt.u32.totalorder %s3131_s23, %s3888_s10 }
  0x39   :  { %p3137_p12 = pnand %p3135_p11, %p3132_p10 }
  0x3b   :  { %3140 = shalt.err (!%p3137_p12)
}
  0x3c   :  { %s3141_s18 = scalar_lea.vmem %s3380_s28, 3072  ;;  %p3146_p0 = scmp.lt.s32.totalorder %s3380_s28, %s3380_s28 }
  0x3d   :  { %p3142_p13 = scmp.ne.s32.totalorder %s3380_s28, %s3141_s18  ;;  %p3147_p1 = scmp.lt.s32.totalorder %s3141_s18, %s3141_s18 }
  0x3f   :  { %p3148_p2 = por %p3147_p1, %p3146_p0 }
  0x41   :  { %p3149_p3 = pnand %p3148_p2, %p3142_p13 }
  0x43   :  { %3152 = shalt.err (!%p3149_p3)
}
  0x44   :  { %102 = dma.hbm_to_vmem [thread:$0]  %s3888_s10, 3072, %s3380_s28, [#allocation13], %s3255_s25, %s3255_s25, %s3256_s26  }
  0x45   :  { %3231 = dma.done.wait [#allocation7], 3072  }
  0x46   :  { %3232 = vsyncadd [#allocation7], 4294964224 }
  0x47   :  { %3233 = dma.done.wait [#allocation10], 6144  }
  0x48   :  { %3234 = vsyncadd [#allocation10], 4294961152 }
  0x49   :  { %3235 = dma.done.wait [#allocation13], 3072  }
  0x4a   :  { %3236 = vsyncadd [#allocation13], 4294964224  ;;  %v3259_v0 = vmov 0   ;;  %v3421_v1 = vld [vmem:[%s3885_s7] sm:$0x7]  ;;  %v2909_v33 = vld [vmem:[%s3878_s0 + $0x8] sm:$0xff]   ;;  %v205_v59 = vlaneseq }
  0x4b   :  { %404 = vmatprep.mubr.bf16.mxu0 %v3259_v0  ;;  %v3426_v2 = vld [vmem:[%s3889_s11] sm:$0x7]  ;;  %v2871_v3 = vld [vmem:[#allocation6 + $0x4] ss:$12 sps:$4 sm:$0xff]   ;;  %v2874_v5 = vld [vmem:[#allocation6 + $0x1c] ss:$12 sps:$4 sm:$0xff]  }
  0x4c   :  { %v2873_v4 = vld [vmem:[#allocation6] ss:$12 sps:$4 sm:$0xff]   ;;  %372 = vmatprep.subr.bf16.mxu0 %v2871_v3  ;;  %v2876_v6 = vld [vmem:[#allocation6 + $0x18] ss:$12 sps:$4 sm:$0xff]   ;;  %v2883_v8 = vld [vmem:[#allocation6 + $0x8] ss:$12 sps:$4 sm:$0xff]  }
  0x4d   :  { %373 = vmatpush1.bf16.msra.mxu0 %v2873_v4  ;;  %v2877_v7 = vld [vmem:[#allocation6 + $0x34] ss:$12 sps:$4 sm:$0xff]   ;;  %v2879_v9 = vld [vmem:[#allocation6 + $0x30] ss:$12 sps:$4 sm:$0xff]   ;;  %v2880_v10 = vld [vmem:[#allocation6 + $0x4c] ss:$12 sps:$4 sm:$0xff]   ;;  %2703 = vmatprep.subr.bf16.mxu1 %v2883_v8 }
  0x4e   :  { %374 = vmatprep.subr.bf16.mxu0 %v2874_v5  ;;  %2704 = vmatpush3.bf16.msra.mxu1 %v2883_v8  ;;  %v2887_v11 = vld [vmem:[#allocation6 + $0x20] ss:$12 sps:$4 sm:$0xff]   ;;  %v2891_v12 = vld [vmem:[#allocation6 + $0x38] ss:$12 sps:$4 sm:$0xff]   ;;  %v2882_v13 = vld [vmem:[#allocation6 + $0x48] ss:$12 sps:$4 sm:$0xff]  }
  0x4f   :  { %2705 = vmatprep.subr.bf16.mxu1 %v2887_v11  ;;  %v2884_v14 = vld [vmem:[#allocation6 + $0x64] ss:$12 sps:$4 sm:$0xff]   ;;  %v2886_v16 = vld [vmem:[#allocation6 + $0x60] ss:$12 sps:$4 sm:$0xff]   ;;  %v2888_v17 = vld [vmem:[#allocation6 + $0x7c] ss:$12 sps:$4 sm:$0xff]  }
  0x50   :  { %v2895_v15 = vld [vmem:[#allocation6 + $0x50] ss:$12 sps:$4 sm:$0xff]   ;;  %v2900_v18 = vld [vmem:[%s3878_s0] sm:$0xff]   ;;  %v2899_v19 = vld [vmem:[#allocation6 + $0x68] ss:$12 sps:$4 sm:$0xff]   ;;  %v206_v60 = vshrl.u32 %v205_v59, 7 }
  0x51   :  { %375 = vmatpush1.bf16.msra.mxu0 %v2876_v6  ;;  %2719 = vmatprep.mubr.bf16.mxu1 %v2900_v18  ;;  %v2890_v20 = vld [vmem:[#allocation6 + $0x78] ss:$12 sps:$4 sm:$0xff]   ;;  %v2892_v21 = vld [vmem:[#allocation6 + $0x94] ss:$12 sps:$4 sm:$0xff]   ;;  %v2894_v23 = vld [vmem:[#allocation6 + $0x90] ss:$12 sps:$4 sm:$0xff]  }
  0x52   :  { %376 = vmatprep.subr.bf16.mxu0 %v2877_v7  ;;  %2706 = vmatpush3.bf16.msra.mxu1 %v2887_v11  ;;  %v2904_v22 = vld [vmem:[#allocation6 + $0x80] ss:$12 sps:$4 sm:$0xff]   ;;  %v2908_v25 = vld [vmem:[#allocation6 + $0x98] ss:$12 sps:$4 sm:$0xff]   ;;  %v2898_v26 = vld [vmem:[#allocation6 + $0xa8] ss:$12 sps:$4 sm:$0xff]  }
  0x53   :  { %2707 = vmatprep.subr.bf16.mxu1 %v2891_v12  ;;  %v2896_v24 = vld [vmem:[#allocation6 + $0xac] ss:$12 sps:$4 sm:$0xff]   ;;  %v2903_v27 = vld [vmem:[#allocation11 + $0x4] ss:$12 sps:$4 sm:$0xff]   ;;  %v2907_v30 = vld [vmem:[#allocation11 + $0x1c] ss:$12 sps:$4 sm:$0xff]  }
  0x54   :  { %v2913_v28 = vld [vmem:[#allocation6 + $0xb0] ss:$12 sps:$4 sm:$0xff]   ;;  %v2901_v29 = vld [vmem:[#allocation11] ss:$12 sps:$4 sm:$0xff]   ;;  %v2917_v31 = vld [vmem:[#allocation11 + $0x8] ss:$12 sps:$4 sm:$0xff]  }
  0x55   :  { %377 = vmatpush1.bf16.msra.mxu0 %v2879_v9  ;;  %v2905_v32 = vld [vmem:[#allocation11 + $0x18] ss:$12 sps:$4 sm:$0xff]   ;;  %v2912_v34 = vld [vmem:[#allocation11 + $0x34] ss:$12 sps:$4 sm:$0xff]   ;;  %v2910_v36 = vld [vmem:[#allocation11 + $0x30] ss:$12 sps:$4 sm:$0xff]  }
  0x56   :  { %378 = vmatprep.subr.bf16.mxu0 %v2880_v10  ;;  %2708 = vmatpush3.bf16.msra.mxu1 %v2891_v12  ;;  %v2922_v35 = vld [vmem:[#allocation11 + $0x20] ss:$12 sps:$4 sm:$0xff]   ;;  %v2918_v37 = vld [vmem:[%s3878_s0 + $0x10] sm:$0xff]   ;;  %v2926_v39 = vld [vmem:[#allocation11 + $0x38] ss:$12 sps:$4 sm:$0xff]   ;;  %v3459_v61 = vsub.s32 0, %v206_v60 }
  0x57   :  { %2709 = vmatprep.subr.bf16.mxu1 %v2895_v15  ;;  %v2916_v38 = vld [vmem:[#allocation11 + $0x4c] ss:$12 sps:$4 sm:$0xff]   ;;  %v2914_v40 = vld [vmem:[#allocation11 + $0x48] ss:$12 sps:$4 sm:$0xff]   ;;  %v2921_v41 = vld [vmem:[#allocation11 + $0x64] ss:$12 sps:$4 sm:$0xff]  }
  0x58   :  { %v2927_v42 = vld [vmem:[%s3878_s0 + $0x18] sm:$0xff]   ;;  %v2919_v44 = vld [vmem:[#allocation11 + $0x60] ss:$12 sps:$4 sm:$0xff]   ;;  %v2935_v47 = vld [vmem:[#allocation11 + $0x68] ss:$12 sps:$4 sm:$0xff]   ;;  %v3464_v63 = vsub.s32 1, %v206_v60 }
  0x59   :  { %379 = vmatpush1.bf16.msra.mxu0 %v2882_v13  ;;  %v2931_v43 = vld [vmem:[#allocation11 + $0x50] ss:$12 sps:$4 sm:$0xff]   ;;  %v2936_v45 = vld [vmem:[%s3879_s1] sm:$0xff]   ;;  %v2934_v52 = vld [vmem:[#allocation11 + $0xac] ss:$12 sps:$4 sm:$0xff]   ;;  %v3472_v5 = vsub.s32 2, %v206_v60 }
  0x5a   :  { %380 = vmatprep.subr.bf16.mxu0 %v2884_v14  ;;  %2710 = vmatpush3.bf16.msra.mxu1 %v2895_v15  ;;  %v2925_v46 = vld [vmem:[#allocation11 + $0x7c] ss:$12 sps:$4 sm:$0xff]   ;;  %v2923_v48 = vld [vmem:[#allocation11 + $0x78] ss:$12 sps:$4 sm:$0xff]   ;;  %v2930_v49 = vld [vmem:[#allocation11 + $0x94] ss:$12 sps:$4 sm:$0xff]  }
  0x5b   :  { %2711 = vmatprep.subr.bf16.mxu1 %v2899_v19  ;;  %v2937_v50 = vld [vmem:[#allocation11 + $0x80] ss:$12 sps:$4 sm:$0xff]   ;;  %v2928_v51 = vld [vmem:[#allocation11 + $0x90] ss:$12 sps:$4 sm:$0xff]   ;;  %v2938_v53 = vld [vmem:[#allocation11 + $0x98] ss:$12 sps:$4 sm:$0xff]  }
  0x5c   :  { %v2932_v54 = vld [vmem:[#allocation11 + $0xa8] ss:$12 sps:$4 sm:$0xff]   ;;  %v2940_v55 = vld [vmem:[#allocation11 + $0xb0] ss:$12 sps:$4 sm:$0xff]   ;;  %v154_v62 = vld [vmem:[%s3883_s5] sm:$0x7] }
  0x5d   :  { %381 = vmatpush1.bf16.msra.mxu0 %v2886_v16  ;;  %v2939_v56 = vld [vmem:[%s3879_s1 + $0x8] sm:$0xff]   ;;  %v2941_v57 = vld [vmem:[%s3879_s1 + $0x10] sm:$0xff]   ;;  %v2942_v58 = vld [vmem:[%s3879_s1 + $0x18] sm:$0xff]   ;;  %v3467_v3 = vrot.slane %v154_v62, %v3459_v61  ;;  %v3470_v4 = vrot.slane %v154_v62, %v3464_v63  ;;  %v216_v10 = vrot.slane %v154_v62, %v3472_v5 }
  0x5e   :  { %382 = vmatprep.subr.bf16.mxu0 %v2888_v17  ;;  %2712 = vmatpush3.bf16.msra.mxu1 %v2899_v19 }
  0x5f   :  { %2713 = vmatprep.subr.bf16.mxu1 %v2904_v22 }
  0x61   :  { %383 = vmatpush1.bf16.msra.mxu0 %v2890_v20 }
  0x62   :  { %384 = vmatprep.subr.bf16.mxu0 %v2892_v21  ;;  %2714 = vmatpush3.bf16.msra.mxu1 %v2904_v22 }
  0x63   :  { %2715 = vmatprep.subr.bf16.mxu1 %v2908_v25 }
  0x65   :  { %385 = vmatpush1.bf16.msra.mxu0 %v2894_v23 }
  0x66   :  { %386 = vmatprep.subr.bf16.mxu0 %v2896_v24  ;;  %2716 = vmatpush3.bf16.msra.mxu1 %v2908_v25 }
  0x67   :  { %2717 = vmatprep.subr.bf16.mxu1 %v2913_v28 }
  0x69   :  { %387 = vmatpush1.bf16.msra.mxu0 %v2898_v26 }
  0x6a   :  { %710 = vmatprep.subr.bf16.mxu0 %v2903_v27  ;;  %2718 = vmatpush3.bf16.msra.mxu1 %v2913_v28 }
  0x6b   :  { %2727 = vmatprep.subr.bf16.mxu1 %v2917_v31 }
  0x6c   :  { %405 = vmatmul.mubr.bf16.vlgmr.msra.gmra.mrb[0].mxu0 %v2900_v18 }
  0x6d   :  { %711 = vmatpush1.bf16.msra.mxu0 %v2901_v29  ;;  %414 = vmatprep.mubr.bf16.mxu0 %v3259_v0 }
  0x6e   :  { %712 = vmatprep.subr.bf16.mxu0 %v2907_v30  ;;  %2720 = vmatmul.mubr.bf16.vlgmr.msra.gmra.mrb[0].mxu1 %v2909_v33 }
  0x6f   :  { %2728 = vmatpush3.bf16.msra.mxu1 %v2917_v31  ;;  %2723 = vmatprep.mubr.bf16.mxu1 %v2918_v37 }
  0x70   :  { %2729 = vmatprep.subr.bf16.mxu1 %v2922_v35 }
  0x71   :  { %713 = vmatpush1.bf16.msra.mxu0 %v2905_v32 }
  0x72   :  { %714 = vmatprep.subr.bf16.mxu0 %v2912_v34 }
  0x73   :  { %2730 = vmatpush3.bf16.msra.mxu1 %v2922_v35 }
  0x74   :  { %415 = vmatmul.mubr.bf16.gmra.mrb[4].mxu0 %v2909_v33  ;;  %2731 = vmatprep.subr.bf16.mxu1 %v2926_v39 }
  0x75   :  { %715 = vmatpush1.bf16.msra.mxu0 %v2910_v36  ;;  %424 = vmatprep.mubr.bf16.mxu0 %v3259_v0 }
  0x76   :  { %716 = vmatprep.subr.bf16.mxu0 %v2916_v38  ;;  %2724 = vmatmul.mubr.bf16.gmra.mrb[4].mxu1 %v2927_v42 }
  0x77   :  { %2732 = vmatpush3.bf16.msra.mxu1 %v2926_v39  ;;  %2743 = vmatprep.mubr.bf16.mxu1 %v2936_v45 }
  0x78   :  { %2733 = vmatprep.subr.bf16.mxu1 %v2931_v43 }
  0x79   :  { %717 = vmatpush1.bf16.msra.mxu0 %v2914_v40 }
  0x7a   :  { %718 = vmatprep.subr.bf16.mxu0 %v2921_v41 }
  0x7b   :  { %2734 = vmatpush3.bf16.msra.mxu1 %v2931_v43 }
  0x7c   :  { %425 = vmatmul.mubr.bf16.gmra.mrb[8].mxu0 %v2918_v37  ;;  %2735 = vmatprep.subr.bf16.mxu1 %v2935_v47 }
  0x7d   :  { %719 = vmatpush1.bf16.msra.mxu0 %v2919_v44  ;;  %434 = vmatprep.mubr.bf16.mxu0 %v3259_v0 }
  0x7e   :  { %720 = vmatprep.subr.bf16.mxu0 %v2925_v46 }
  0x7f   :  { %2736 = vmatpush3.bf16.msra.mxu1 %v2935_v47 }
  0x80   :  { %2737 = vmatprep.subr.bf16.mxu1 %v2937_v50 }
  0x81   :  { %721 = vmatpush1.bf16.msra.mxu0 %v2923_v48 }
  0x82   :  { %722 = vmatprep.subr.bf16.mxu0 %v2930_v49 }
  0x83   :  { %2738 = vmatpush3.bf16.msra.mxu1 %v2937_v50 }
  0x84   :  { %435 = vmatmul.mubr.bf16.gmra.mrb[12].mxu0 %v2927_v42  ;;  %2739 = vmatprep.subr.bf16.mxu1 %v2938_v53 }
  0x85   :  { %723 = vmatpush1.bf16.msra.mxu0 %v2928_v51  ;;  %742 = vmatprep.mubr.bf16.mxu0 %v3259_v0 }
  0x86   :  { %724 = vmatprep.subr.bf16.mxu0 %v2934_v52 }
  0x87   :  { %2740 = vmatpush3.bf16.msra.mxu1 %v2938_v53 }
  0x88   :  { %2741 = vmatprep.subr.bf16.mxu1 %v2940_v55 }
  0x89   :  { %725 = vmatpush1.bf16.msra.mxu0 %v2932_v54 }
  0x8b   :  { %2742 = vmatpush3.bf16.msra.mxu1 %v2940_v55 }
  0x8c   :  { %743 = vmatmul.mubr.bf16.vlgmr.msra.gmra.mrb[16].mxu0 %v2936_v45 }
  0x8d   :  { %752 = vmatprep.mubr.bf16.mxu0 %v3259_v0 }
  0x8e   :  { %2744 = vmatmul.mubr.bf16.vlgmr.msra.gmra.mrb[8].mxu1 %v2939_v56 }
  0x8f   :  { %2747 = vmatprep.mubr.bf16.mxu1 %v2941_v57 }
  0x94   :  { %753 = vmatmul.mubr.bf16.gmra.mrb[20].mxu0 %v2939_v56 }
  0x95   :  { %762 = vmatprep.mubr.bf16.mxu0 %v3259_v0 }
  0x96   :  { %2748 = vmatmul.mubr.bf16.gmra.mrb[12].mxu1 %v2942_v58 }
  0x9c   :  { %763 = vmatmul.mubr.bf16.gmra.mrb[24].mxu0 %v2941_v57 }
  0x9d   :  { %772 = vmatprep.mubr.bf16.mxu0 %v3259_v0 }
  0xa4   :  { %773 = vmatmul.mubr.bf16.gmra.mrb[28].mxu0 %v2942_v58 }
 0x13f   :  { %v406_v0 = vpop.f32.mrb[0].mxu0 }
 0x140   :  { %v407_v6 = vadd.f32 %v406_v0, %v3467_v3  ;;  %v408_v7 = vpop.f32.mrb[1].mxu0 }
 0x141   :  { %v409_v8 = vadd.f32 %v408_v7, %v3470_v4  ;;  %v410_v9 = vpop.f32.mrb[2].mxu0  ;;  %v2721_v15 = vpop.f32.mrb[0].mxu1 }
 0x142   :  { %v411_v11 = vadd.f32 %v410_v9, %v3467_v3  ;;  %v412_v12 = vpop.f32.mrb[3].mxu0  ;;  %v488_v17 = vadd.f32 %v2721_v15, %v216_v10  ;;  %v479_v18 = vpop.f32.mrb[1].mxu1 }
 0x143   :  { %v2605_v13 = vpack.c.bf16 %v409_v8, %v407_v6  ;;  %v413_v14 = vadd.f32 %v412_v12, %v3470_v4  ;;  %v480_v19 = vadd.f32 %v479_v18, %v216_v10  ;;  %v2722_v20 = vpop.f32.mrb[2].mxu1  ;;  %v155_v8 = vld [vmem:[%s3887_s9] sm:$0x7]  ;;  %s3521_s9 = smov 0  }
 0x144   :  { %v2610_v22 = vpack.c.bf16 %v488_v17, %v488_v17  ;;  %v491_v23 = vadd.f32 %v2722_v20, %v216_v10  ;;  %v482_v24 = vpop.f32.mrb[3].mxu1  ;;  %v3498_v15 = vrot.slane %v155_v8, %v3464_v63  ;;  %v554_v20 = vrot.slane %v155_v8, %v3472_v5 }
 0x145   :  { %955 = vst [vmem:[#allocation2] sm:$0xff] %v2605_v13  ;;  %v2607_v16 = vpack.c.bf16 %v413_v14, %v411_v11  ;;  %v2606_v27 = vpack.c.bf16 %v480_v19, %v480_v19  ;;  %v483_v28 = vadd.f32 %v482_v24, %v216_v10  ;;  %v3495_v13 = vrot.slane %v155_v8, %v3459_v61 }
 0x146   :  { %960 = vst [vmem:[#allocation2 + $0x20] sm:$0xf] %v2610_v22  ;;  %v2612_v31 = vpack.c.bf16 %v491_v23, %v491_v23 }
 0x147   :  { %957 = vst [vmem:[#allocation2 + $0xc] sm:$0xff] %v2607_v16  ;;  %v416_v21 = vpop.f32.mrb[4].mxu0  ;;  %956 = vst [vmem:[#allocation2 + $0x8] sm:$0xf] %v2606_v27  ;;  %v2608_v34 = vpack.c.bf16 %v483_v28, %v483_v28 }
 0x148   :  { %v417_v25 = vadd.f32 %v416_v21, %v3467_v3  ;;  %v418_v26 = vpop.f32.mrb[5].mxu0  ;;  %962 = vst [vmem:[#allocation2 + $0x2c] sm:$0xf] %v2612_v31 }
 0x149   :  { %v419_v29 = vadd.f32 %v418_v26, %v3470_v4  ;;  %v420_v30 = vpop.f32.mrb[6].mxu0  ;;  %958 = vst [vmem:[#allocation2 + $0x14] sm:$0xf] %v2608_v34  ;;  %v2725_v37 = vpop.f32.mrb[4].mxu1 }
 0x14a   :  { %v421_v32 = vadd.f32 %v420_v30, %v3467_v3  ;;  %v422_v33 = vpop.f32.mrb[7].mxu0  ;;  %v504_v39 = vadd.f32 %v2725_v37, %v216_v10  ;;  %v495_v40 = vpop.f32.mrb[5].mxu1 }
 0x14b   :  { %v2609_v35 = vpack.c.bf16 %v419_v29, %v417_v25  ;;  %v423_v36 = vadd.f32 %v422_v33, %v3470_v4  ;;  %v496_v41 = vadd.f32 %v495_v40, %v216_v10  ;;  %v2726_v42 = vpop.f32.mrb[6].mxu1 }
 0x14c   :  { %v2618_v44 = vpack.c.bf16 %v504_v39, %v504_v39  ;;  %v507_v45 = vadd.f32 %v2726_v42, %v216_v10  ;;  %v498_v46 = vpop.f32.mrb[7].mxu1 }
 0x14d   :  { %959 = vst [vmem:[#allocation2 + $0x18] sm:$0xff] %v2609_v35  ;;  %v2611_v38 = vpack.c.bf16 %v423_v36, %v421_v32  ;;  %v2614_v49 = vpack.c.bf16 %v496_v41, %v496_v41  ;;  %v499_v50 = vadd.f32 %v498_v46, %v216_v10 }
 0x14e   :  { %968 = vst [vmem:[#allocation2 + $0x50] sm:$0xf] %v2618_v44  ;;  %v2620_v53 = vpack.c.bf16 %v507_v45, %v507_v45 }
 0x14f   :  { %961 = vst [vmem:[#allocation2 + $0x24] sm:$0xff] %v2611_v38  ;;  %v426_v43 = vpop.f32.mrb[8].mxu0  ;;  %964 = vst [vmem:[#allocation2 + $0x38] sm:$0xf] %v2614_v49  ;;  %v2616_v56 = vpack.c.bf16 %v499_v50, %v499_v50 }
 0x150   :  { %v427_v47 = vadd.f32 %v426_v43, %v3467_v3  ;;  %v428_v48 = vpop.f32.mrb[9].mxu0  ;;  %970 = vst [vmem:[#allocation2 + $0x5c] sm:$0xf] %v2620_v53 }
 0x151   :  { %v429_v51 = vadd.f32 %v428_v48, %v3470_v4  ;;  %v430_v52 = vpop.f32.mrb[10].mxu0  ;;  %966 = vst [vmem:[#allocation2 + $0x44] sm:$0xf] %v2616_v56 }
 0x152   :  { %v431_v54 = vadd.f32 %v430_v52, %v3467_v3  ;;  %v432_v55 = vpop.f32.mrb[11].mxu0 }
 0x153   :  { %v2613_v57 = vpack.c.bf16 %v429_v51, %v427_v47  ;;  %v433_v58 = vadd.f32 %v432_v55, %v3470_v4 }
 0x155   :  { %963 = vst [vmem:[#allocation2 + $0x30] sm:$0xff] %v2613_v57  ;;  %v2615_v59 = vpack.c.bf16 %v433_v58, %v431_v54 }
 0x157   :  { %965 = vst [vmem:[#allocation2 + $0x3c] sm:$0xff] %v2615_v59  ;;  %v436_v60 = vpop.f32.mrb[12].mxu0 }
 0x158   :  { %v437_v62 = vadd.f32 %v436_v60, %v3467_v3  ;;  %v438_v0 = vpop.f32.mrb[13].mxu0 }
 0x159   :  { %v439_v6 = vadd.f32 %v438_v0, %v3470_v4  ;;  %v440_v7 = vpop.f32.mrb[14].mxu0 }
 0x15a   :  { %v441_v9 = vadd.f32 %v440_v7, %v3467_v3  ;;  %v442_v10 = vpop.f32.mrb[15].mxu0 }
 0x15b   :  { %v2617_v11 = vpack.c.bf16 %v439_v6, %v437_v62  ;;  %v443_v12 = vadd.f32 %v442_v10, %v3470_v4 }
 0x15d   :  { %967 = vst [vmem:[#allocation2 + $0x48] sm:$0xff] %v2617_v11  ;;  %v2619_v14 = vpack.c.bf16 %v443_v12, %v441_v9 }
 0x15f   :  { %969 = vst [vmem:[#allocation2 + $0x54] sm:$0xff] %v2619_v14  ;;  %v744_v16 = vpop.f32.mrb[16].mxu0 }
 0x160   :  { %v745_v17 = vadd.f32 %v744_v16, %v3495_v13  ;;  %v746_v18 = vpop.f32.mrb[17].mxu0 }
 0x161   :  { %v747_v19 = vadd.f32 %v746_v18, %v3498_v15  ;;  %v748_v3 = vpop.f32.mrb[18].mxu0  ;;  %v2745_v24 = vpop.f32.mrb[8].mxu1 }
 0x162   :  { %v749_v4 = vadd.f32 %v748_v3, %v3495_v13  ;;  %v750_v21 = vpop.f32.mrb[19].mxu0  ;;  %v826_v26 = vadd.f32 %v2745_v24, %v554_v20  ;;  %v817_v27 = vpop.f32.mrb[9].mxu1 }
 0x163   :  { %v2621_v22 = vpack.c.bf16 %v747_v19, %v745_v17  ;;  %v751_v23 = vadd.f32 %v750_v21, %v3498_v15  ;;  %v818_v28 = vadd.f32 %v817_v27, %v554_v20  ;;  %v2746_v29 = vpop.f32.mrb[10].mxu1 }
 0x164   :  { %v2626_v31 = vpack.c.bf16 %v826_v26, %v826_v26  ;;  %v829_v32 = vadd.f32 %v2746_v29, %v554_v20  ;;  %v820_v33 = vpop.f32.mrb[11].mxu1 }
 0x165   :  { %1077 = vst [vmem:[#allocation3] sm:$0xff] %v2621_v22  ;;  %v2623_v25 = vpack.c.bf16 %v751_v23, %v749_v4  ;;  %v2622_v36 = vpack.c.bf16 %v818_v28, %v818_v28  ;;  %v821_v37 = vadd.f32 %v820_v33, %v554_v20  ;;  %v3517_v22 = vmov 0.0  }
 0x166   :  { %1082 = vst [vmem:[#allocation3 + $0x20] sm:$0xf] %v2626_v31  ;;  %v2628_v40 = vpack.c.bf16 %v829_v32, %v829_v32  ;;  %v3519_v23 = vmov 0.0  }
 0x167   :  { %1079 = vst [vmem:[#allocation3 + $0xc] sm:$0xff] %v2623_v25  ;;  %v754_v30 = vpop.f32.mrb[20].mxu0  ;;  %1078 = vst [vmem:[#allocation3 + $0x8] sm:$0xf] %v2622_v36  ;;  %v2624_v43 = vpack.c.bf16 %v821_v37, %v821_v37 }
 0x168   :  { %v755_v34 = vadd.f32 %v754_v30, %v3495_v13  ;;  %v756_v35 = vpop.f32.mrb[21].mxu0  ;;  %1084 = vst [vmem:[#allocation3 + $0x2c] sm:$0xf] %v2628_v40 }
 0x169   :  { %v757_v38 = vadd.f32 %v756_v35, %v3498_v15  ;;  %v758_v39 = vpop.f32.mrb[22].mxu0  ;;  %1080 = vst [vmem:[#allocation3 + $0x14] sm:$0xf] %v2624_v43  ;;  %v2749_v46 = vpop.f32.mrb[12].mxu1 }
 0x16a   :  { %v759_v41 = vadd.f32 %v758_v39, %v3495_v13  ;;  %v760_v42 = vpop.f32.mrb[23].mxu0  ;;  %v842_v48 = vadd.f32 %v2749_v46, %v554_v20  ;;  %v833_v49 = vpop.f32.mrb[13].mxu1 }
 0x16b   :  { %v2625_v44 = vpack.c.bf16 %v757_v38, %v755_v34  ;;  %v761_v45 = vadd.f32 %v760_v42, %v3498_v15  ;;  %v834_v50 = vadd.f32 %v833_v49, %v554_v20  ;;  %v2750_v51 = vpop.f32.mrb[14].mxu1 }
 0x16c   :  { %v2634_v53 = vpack.c.bf16 %v842_v48, %v842_v48  ;;  %v845_v54 = vadd.f32 %v2750_v51, %v554_v20  ;;  %v836_v55 = vpop.f32.mrb[15].mxu1 }
 0x16d   :  { %1081 = vst [vmem:[#allocation3 + $0x18] sm:$0xff] %v2625_v44  ;;  %v2627_v47 = vpack.c.bf16 %v761_v45, %v759_v41  ;;  %v2630_v58 = vpack.c.bf16 %v834_v50, %v834_v50  ;;  %v837_v59 = vadd.f32 %v836_v55, %v554_v20 }
 0x16e   :  { %1090 = vst [vmem:[#allocation3 + $0x50] sm:$0xf] %v2634_v53  ;;  %v2636_v0 = vpack.c.bf16 %v845_v54, %v845_v54 }
 0x16f   :  { %1083 = vst [vmem:[#allocation3 + $0x24] sm:$0xff] %v2627_v47  ;;  %v764_v52 = vpop.f32.mrb[24].mxu0  ;;  %1086 = vst [vmem:[#allocation3 + $0x38] sm:$0xf] %v2630_v58  ;;  %v2632_v8 = vpack.c.bf16 %v837_v59, %v837_v59 }
 0x170   :  { %v765_v56 = vadd.f32 %v764_v52, %v3495_v13  ;;  %v766_v57 = vpop.f32.mrb[25].mxu0  ;;  %1092 = vst [vmem:[#allocation3 + $0x5c] sm:$0xf] %v2636_v0 }
 0x171   :  { %v767_v60 = vadd.f32 %v766_v57, %v3498_v15  ;;  %v768_v62 = vpop.f32.mrb[26].mxu0  ;;  %1088 = vst [vmem:[#allocation3 + $0x44] sm:$0xf] %v2632_v8 }
 0x172   :  { %v769_v6 = vadd.f32 %v768_v62, %v3495_v13  ;;  %v770_v7 = vpop.f32.mrb[27].mxu0 }
 0x173   :  { %v2629_v9 = vpack.c.bf16 %v767_v60, %v765_v56  ;;  %v771_v10 = vadd.f32 %v770_v7, %v3498_v15 }
 0x175   :  { %1085 = vst [vmem:[#allocation3 + $0x30] sm:$0xff] %v2629_v9  ;;  %v2631_v11 = vpack.c.bf16 %v771_v10, %v769_v6 }
 0x177   :  { %1087 = vst [vmem:[#allocation3 + $0x3c] sm:$0xff] %v2631_v11  ;;  %v774_v12 = vpop.f32.mrb[28].mxu0 }
 0x178   :  { %v775_v14 = vadd.f32 %v774_v12, %v3495_v13  ;;  %v776_v16 = vpop.f32.mrb[29].mxu0 }
 0x179   :  { %v777_v17 = vadd.f32 %v776_v16, %v3498_v15  ;;  %v778_v18 = vpop.f32.mrb[30].mxu0 }
 0x17a   :  { %v779_v19 = vadd.f32 %v778_v18, %v3495_v13  ;;  %v780_v3 = vpop.f32.mrb[31].mxu0 }
 0x17b   :  { %v2633_v20 = vpack.c.bf16 %v777_v17, %v775_v14  ;;  %v781_v4 = vadd.f32 %v780_v3, %v3498_v15 }
 0x17d   :  { %1089 = vst [vmem:[#allocation3 + $0x48] sm:$0xff] %v2633_v20  ;;  %v2635_v21 = vpack.c.bf16 %v781_v4, %v779_v19 }
 0x17f   :  { %1091 = vst [vmem:[#allocation3 + $0x54] sm:$0xff] %v2635_v21 }
 0x180 LB: > { %v3532_v13 = vld [vmem:[#allocation9 + $0x4] ss:$12 sps:$4 sm:$0xff]   ;;  %v3534_v15 = vld [vmem:[#allocation9] ss:$12 sps:$4 sm:$0xff]   ;;  %v3260_v24 = vmov 0.0   ;;  %v3261_v25 = vmov 0   ;;  %v1117_v47 = vpack.c.bf16 %v3247_v23, %v3247_v23  ;;  %v1419_v18 = vpack.c.bf16 %v3243_v22, %v3243_v22  ;;  %s3251_s9 = sphi %s3521_s9, %s1102_s9   ;;  %v3247_v23 = vphi %v3519_v23, %v3894_v23   ;;  %v3243_v22 = vphi %v3517_v22, %v3893_v22  }
 0x181   : > { %2751 = vmatprep.subr.bf16.mxu1 %v3260_v24  ;;  %1326 = vmatprep.mubr.bf16.mxu0 %v3261_v25  ;;  %v3539_v26 = vld [vmem:[#allocation9 + $0x1c] ss:$12 sps:$4 sm:$0xff]   ;;  %vm3262_vm0 = vmmov 0   ;;  %v3544_v27 = vld [vmem:[#allocation9 + $0x18] ss:$12 sps:$4 sm:$0xff]   ;;  %s2483_s24 = sshll.u32 %s3251_s9, 1 }
 0x182   : > { %1294 = vmatprep.subr.bf16.mxu0 %v3532_v13  ;;  %2767 = vmatprep.mubr.msk.bf16.mxu1 %vm3262_vm0, %v3260_v24  ;;  %v3548_v28 = vld [vmem:[#allocation9 + $0x34] ss:$12 sps:$4 sm:$0xff]   ;;  %v3552_v29 = vld [vmem:[#allocation9 + $0x30] ss:$12 sps:$4 sm:$0xff]   ;;  %v3555_v30 = vld [vmem:[#allocation9 + $0x4c] ss:$12 sps:$4 sm:$0xff]  }
 0x183   : > { %1295 = vmatpush1.bf16.msra.mxu0 %v3534_v15  ;;  %2943 = vset.pattern.permute.xlu0 %v3261_v25  ;;  %v2966_v31 = vld [vmem:[#allocation9 + $0x8] ss:$12 sps:$4 sm:$0xff]   ;;  %v3560_v33 = vld [vmem:[#allocation9 + $0x64] ss:$12 sps:$4 sm:$0xff]   ;;  %v2970_v34 = vld [vmem:[#allocation9 + $0x20] ss:$12 sps:$4 sm:$0xff]  }
 0x184   : > { %1296 = vmatprep.subr.bf16.mxu0 %v3539_v26  ;;  %2944 = vset.pattern.permute.xlu1 %v3261_v25  ;;  %v3558_v32 = vld [vmem:[#allocation9 + $0x48] ss:$12 sps:$4 sm:$0xff]   ;;  %v3564_v35 = vld [vmem:[#allocation9 + $0x60] ss:$12 sps:$4 sm:$0xff]   ;;  %v2974_v37 = vld [vmem:[#allocation9 + $0x38] ss:$12 sps:$4 sm:$0xff]  }
 0x185   : > { %2752 = vmatpush3.bf16.msra.mxu1 %v2966_v31  ;;  %v3567_v36 = vld [vmem:[#allocation9 + $0x7c] ss:$12 sps:$4 sm:$0xff]   ;;  %v3572_v38 = vld [vmem:[#allocation9 + $0x78] ss:$12 sps:$4 sm:$0xff]   ;;  %v3575_v39 = vld [vmem:[#allocation9 + $0x94] ss:$12 sps:$4 sm:$0xff]  }
 0x186   : > { %2753 = vmatprep.subr.bf16.mxu1 %v3260_v24  ;;  %v2978_v40 = vld [vmem:[#allocation9 + $0x50] ss:$12 sps:$4 sm:$0xff]   ;;  %v3582_v42 = vld [vmem:[#allocation9 + $0xac] ss:$12 sps:$4 sm:$0xff]   ;;  %v2982_v43 = vld [vmem:[#allocation9 + $0x68] ss:$12 sps:$4 sm:$0xff]  }
 0x187   : > { %1297 = vmatpush1.bf16.msra.mxu0 %v3544_v27  ;;  %v3578_v41 = vld [vmem:[#allocation9 + $0x90] ss:$12 sps:$4 sm:$0xff]   ;;  %s3588_s19 = ssub.s32 7, %s2483_s24  ;;  %v3591_v44 = vld [vmem:[#allocation9 + $0xa8] ss:$12 sps:$4 sm:$0xff]   ;;  %s2637_s20 = sshll.u32 %s3251_s9, 4 }
 0x188   : > { %1298 = vmatprep.subr.bf16.mxu0 %v3548_v28  ;;  %v3593_v45 = vld [vmem:[#allocation12 + $0x4] ss:$12 sps:$4 sm:$0xff]   ;;  %v2986_v46 = vld [vmem:[#allocation9 + $0x80] ss:$12 sps:$4 sm:$0xff]   ;;  %s2513_s21 = sshll.u32 %s3588_s19, 3  ;;  %s3615_s10 = scalar_lea.vmem %s3880_s2, %s2637_s20 }
 0x189   : > { %2754 = vmatpush3.bf16.msra.mxu1 %v2970_v34  ;;  %v3601_v48 = vld [vmem:[#allocation12] ss:$12 sps:$4 sm:$0xff]   ;;  %v3604_v49 = vld [vmem:[#allocation12 + $0x1c] ss:$12 sps:$4 sm:$0xff]   ;;  %v2990_v50 = vld [vmem:[#allocation9 + $0x98] ss:$12 sps:$4 sm:$0xff]   ;;  %s1409_s26 = scalar_lea.vmem %s3881_s3, %s2513_s21 }
 0x18a   : > { %2755 = vmatprep.subr.bf16.mxu1 %v3260_v24  ;;  %v3608_v51 = vld [vmem:[#allocation12 + $0x18] ss:$12 sps:$4 sm:$0xff]   ;;  %v3618_v52 = vld [vmem:[#allocation12 + $0x34] ss:$12 sps:$4 sm:$0xff]   ;;  %v2994_v53 = vld [vmem:[#allocation9 + $0xb0] ss:$12 sps:$4 sm:$0xff]  }
 0x18b   : > { %1299 = vmatpush1.bf16.msra.mxu0 %v3552_v29  ;;  %v3627_v54 = vld [vmem:[#allocation12 + $0x30] ss:$12 sps:$4 sm:$0xff]   ;;  %v1108_v55 = vld [vmem:[%s3615_s10] sm:$0xff]  ;;  %v3631_v56 = vld [vmem:[#allocation12 + $0x4c] ss:$12 sps:$4 sm:$0xff]   ;;  %s3707_s28 = ssub.s32 6, %s2483_s24 }
 0x18c   : > { %1300 = vmatprep.subr.bf16.mxu0 %v3555_v30  ;;  %v2998_v57 = vld [vmem:[#allocation12 + $0x8] ss:$12 sps:$4 sm:$0xff]   ;;  %1399 = vperm.xlu0 %2943, %v1108_v55   ;;  %v1410_v58 = vld [vmem:[%s1409_s26] sm:$0xff]  ;;  %v3004_v10 = vld [vmem:[#allocation12 + $0x50] ss:$12 sps:$4 sm:$0xff]   ;;  %s2577_s16 = sshll.u32 %s3707_s28, 3 }
 0x18d   : > { %2756 = vmatpush3.bf16.msra.mxu1 %v2974_v37  ;;  %v3635_v59 = vld [vmem:[#allocation12 + $0x48] ss:$12 sps:$4 sm:$0xff]   ;;  %v3638_v60 = vld [vmem:[#allocation12 + $0x64] ss:$12 sps:$4 sm:$0xff]   ;;  %v3002_v62 = vld [vmem:[#allocation12 + $0x20] ss:$12 sps:$4 sm:$0xff]   ;;  %s1997_s30 = scalar_lea.vmem %s3881_s3, %s2577_s16 }
 0x18e   : > { %2757 = vmatprep.subr.bf16.mxu1 %v3260_v24  ;;  %v3642_v0 = vld [vmem:[#allocation12 + $0x60] ss:$12 sps:$4 sm:$0xff]   ;;  %v3647_v6 = vld [vmem:[#allocation12 + $0x7c] ss:$12 sps:$4 sm:$0xff]   ;;  %v3003_v7 = vld [vmem:[#allocation12 + $0x38] ss:$12 sps:$4 sm:$0xff]  }
 0x18f   : > { %1301 = vmatpush1.bf16.msra.mxu0 %v3558_v32  ;;  %v3653_v8 = vld [vmem:[#allocation12 + $0x78] ss:$12 sps:$4 sm:$0xff]   ;;  %v3656_v9 = vld [vmem:[#allocation12 + $0x94] ss:$12 sps:$4 sm:$0xff]   ;;  %v3660_v11 = vld [vmem:[#allocation12 + $0x90] ss:$12 sps:$4 sm:$0xff]  }
 0x190   : > { %1302 = vmatprep.subr.bf16.mxu0 %v3560_v33  ;;  %1701 = vperm.xlu0 %2943, %v1410_v58   ;;  %v3663_v12 = vld [vmem:[#allocation12 + $0xac] ss:$12 sps:$4 sm:$0xff]   ;;  %v3005_v14 = vld [vmem:[#allocation12 + $0x68] ss:$12 sps:$4 sm:$0xff]   ;;  %v3008_v3 = vld [vmem:[#allocation12 + $0xb0] ss:$12 sps:$4 sm:$0xff]   ;;  %v3733_v58 = vrot.slane %v3421_v1, %v3472_v5 }
 0x191   : > { %2758 = vmatpush3.bf16.msra.mxu1 %v2978_v40  ;;  %v3667_v16 = vld [vmem:[#allocation12 + $0xa8] ss:$12 sps:$4 sm:$0xff]   ;;  %v3006_v17 = vld [vmem:[#allocation12 + $0x80] ss:$12 sps:$4 sm:$0xff]   ;;  %v3007_v19 = vld [vmem:[#allocation12 + $0x98] ss:$12 sps:$4 sm:$0xff]  }
 0x192   : > { %2759 = vmatprep.subr.bf16.mxu1 %v3260_v24  ;;  %v3009_v20 = vld [vmem:[#allocation9 + $0x8] ss:$12 sps:$4 sm:$0xff]   ;;  %v3010_v4 = vld [vmem:[#allocation9 + $0x20] ss:$12 sps:$4 sm:$0xff]   ;;  %v3011_v21 = vld [vmem:[#allocation9 + $0x38] ss:$12 sps:$4 sm:$0xff]  }
 0x193   : > { %1303 = vmatpush1.bf16.msra.mxu0 %v3564_v35  ;;  %s2638_s0 = smul.u32 24, %s3251_s9  ;;  %s3757_s15 = scalar_lea.vmem [#allocation14], %s2637_s20 }
 0x194   : > { %1304 = vmatprep.subr.bf16.mxu0 %v3567_v36  ;;  %s2639_s27 = smul.u32 12, %s3588_s19  ;;  %s1707_s17 = scalar_lea.vmem [#allocation15], %s2513_s21 }
 0x195   : > { %2760 = vmatpush3.bf16.msra.mxu1 %v2982_v43  ;;  %s3717_s23 = scalar_lea.vmem [#allocation2], %s2638_s0  ;;  %s2642_s18 = smul.u32 12, %s3707_s28 }
 0x196   : > { %2761 = vmatprep.subr.bf16.mxu1 %v3260_v24  ;;  %v1112_v31 = vld [vmem:[%s3717_s23] sm:$0xff]  ;;  %s3739_s29 = scalar_lea.vmem [#allocation3], %s2639_s27  ;;  %s2279_s1 = scalar_lea.vmem [#allocation15], %s2577_s16 }
 0x197   : > { %1305 = vmatpush1.bf16.msra.mxu0 %v3572_v38  ;;  %v1114_v34 = vunpack.c.l.bf16 %v1112_v31  ;;  %s3810_s8 = scalar_lea.vmem [#allocation3], %s2642_s18  ;;  %s1102_s9 = sadd.s32 1, %s3251_s9  }
 0x198   : > { %1306 = vmatprep.subr.bf16.mxu0 %v3575_v39  ;;  %p1099_p4 = scmp.ge.s32.totalorder %s1102_s9, 4  }
 0x199   : > { %2762 = vmatpush3.bf16.msra.mxu1 %v2986_v46  ;;  %s3263_s5 = smov (%p1099_p4), [#allocation15]   ;;  %s3264_s19 = smov (%p1099_p4), [#allocation14]  }
 0x19a   : > { %2763 = vmatprep.subr.bf16.mxu1 %v3260_v24  ;;  %s2309_s24 = sshll.u32 (%p1099_p4), %s3263_s5, 4  ;;  %s2293_s20 = sshll.u32 (%p1099_p4), %s3264_s19, 4  ;;  %s2310_s24 = int_to_ptr.vmem [resolvable:$true] %s2309_s24  ;;  %s3835_s20 = int_to_ptr.vmem [resolvable:$true] %s2293_s20 }
 0x19b   : > { %1307 = vmatpush1.bf16.msra.mxu0 %v3578_v41  ;;  %s3153_s21 = scalar_lea.vmem (%p1099_p4), %s2310_s24, 1024  ;;  %p3158_p6 = scmp.lt.s32.totalorder (%p1099_p4), %s2310_s24, %s2310_s24 }
 0x19c   : > { %1308 = vmatprep.subr.bf16.mxu0 %v3582_v42  ;;  %p3154_p5 = scmp.ne.s32.totalorder (%p1099_p4), %s2310_s24, %s3153_s21  ;;  %p3159_p7 = scmp.lt.s32.totalorder (%p1099_p4), %s3153_s21, %s3153_s21 }
 0x19d   : > { %2764 = vmatpush3.bf16.msra.mxu1 %v2990_v50 }
 0x19e   : > { %2765 = vmatprep.subr.bf16.mxu1 %v3260_v24  ;;  %p3160_p8 = por (%p1099_p4), %p3159_p7, %p3158_p6 }
 0x19f   : > { %1309 = vmatpush1.bf16.msra.mxu0 %v3591_v44 }
 0x1a0   : > { %1596 = vmatprep.subr.bf16.mxu0 %v3593_v45  ;;  %p3161_p9 = pnand (%p1099_p4), %p3160_p8, %p3154_p5 }
 0x1a1   : > { %2766 = vmatpush3.bf16.msra.mxu1 %v2994_v53 }
 0x1a2   : > { %1327 = vmatmul.mubr.bf16.vlgmr.msra.gmra.mrb[0].mxu0 %v1117_v47  ;;  %2771 = vmatprep.subr.bf16.mxu1 %v3260_v24 }
 0x1a3   : > { %1597 = vmatpush1.bf16.msra.mxu0 %v3601_v48  ;;  %1628 = vmatprep.mubr.bf16.mxu0 %v3261_v25 }
 0x1a4   : > { %1598 = vmatprep.subr.bf16.mxu0 %v3604_v49  ;;  %2768 = vmatmul.mubr.bf16.vlgmr.msra.gmra.mrb[0].mxu1 %v1117_v47 }
 0x1a5   : > { %2772 = vmatpush3.bf16.msra.mxu1 %v2998_v57  ;;  %2787 = vmatprep.mubr.msk.bf16.mxu1 %vm3262_vm0, %v3260_v24 }
 0x1a6   : > { %2773 = vmatprep.subr.bf16.mxu1 %v3260_v24 }
 0x1a7   : > { %1599 = vmatpush1.bf16.msra.mxu0 %v3608_v51 }
 0x1a8   : > { %1600 = vmatprep.subr.bf16.mxu0 %v3618_v52 }
 0x1a9   : > { %2774 = vmatpush3.bf16.msra.mxu1 %v3002_v62 }
 0x1aa   : > { %2775 = vmatprep.subr.bf16.mxu1 %v3260_v24 }
 0x1ab   : > { %1601 = vmatpush1.bf16.msra.mxu0 %v3627_v54 }
 0x1ac   : > { %1602 = vmatprep.subr.bf16.mxu0 %v3631_v56 }
 0x1ad   : > { %2776 = vmatpush3.bf16.msra.mxu1 %v3003_v7  ;;  %v3736_v7 = vld [vmem:[%s3717_s23 + $0x8] ss:$12 sps:$4 sm:$0xff]  }
 0x1ae   : > { %2777 = vmatprep.subr.bf16.mxu1 %v3260_v24 }
 0x1af   : > { %1603 = vmatpush1.bf16.msra.mxu0 %v3635_v59 }
 0x1b0   : > { %1604 = vmatprep.subr.bf16.mxu0 %v3638_v60 }
 0x1b1   : > { %2778 = vmatpush3.bf16.msra.mxu1 %v3004_v10 }
 0x1b2   : > { %2779 = vmatprep.subr.bf16.mxu1 %v3260_v24 }
 0x1b3   : > { %1605 = vmatpush1.bf16.msra.mxu0 %v3642_v0 }
 0x1b4   : > { %1606 = vmatprep.subr.bf16.mxu0 %v3647_v6 }
 0x1b5   : > { %2780 = vmatpush3.bf16.msra.mxu1 %v3005_v14 }
 0x1b6   : > { %2781 = vmatprep.subr.bf16.mxu1 %v3260_v24 }
 0x1b7   : > { %1607 = vmatpush1.bf16.msra.mxu0 %v3653_v8 }
 0x1b8   : > { %1608 = vmatprep.subr.bf16.mxu0 %v3656_v9 }
 0x1b9   : > { %2782 = vmatpush3.bf16.msra.mxu1 %v3006_v17  ;;  %v1414_v17 = vld [vmem:[%s3739_s29] sm:$0xff] }
 0x1ba   : > { %2783 = vmatprep.subr.bf16.mxu1 %v3260_v24 }
 0x1bb   : > { %1609 = vmatpush1.bf16.msra.mxu0 %v3660_v11 }
 0x1bc   : > { %1610 = vmatprep.subr.bf16.mxu0 %v3663_v12 }
 0x1bd   : > { %2784 = vmatpush3.bf16.msra.mxu1 %v3007_v19  ;;  %v3745_v19 = vrot.slane %v3426_v2, %v3459_v61 }
 0x1be   : > { %2785 = vmatprep.subr.bf16.mxu1 %v3260_v24 }
 0x1bf   : > { %1611 = vmatpush1.bf16.msra.mxu0 %v3667_v16 }
 0x1c0   : > { %1882 = vmatprep.subr.bf16.mxu0 %v3532_v13  ;;  %v3012_v13 = vld [vmem:[#allocation9 + $0x50] ss:$12 sps:$4 sm:$0xff]  }
 0x1c1   : > { %2786 = vmatpush3.bf16.msra.mxu1 %v3008_v3 }
 0x1c2   : > { %1629 = vmatmul.mubr.bf16.vlgmr.msra.gmra.mrb[4].mxu0 %v1419_v18  ;;  %2791 = vmatprep.subr.bf16.mxu1 %v3260_v24 }
 0x1c3   : > { %1883 = vmatpush1.bf16.msra.mxu0 %v3534_v15  ;;  %1914 = vmatprep.mubr.bf16.mxu0 %v3261_v25  ;;  %v3013_v15 = vld [vmem:[#allocation9 + $0x68] ss:$12 sps:$4 sm:$0xff]  }
 0x1c4   : > { %1884 = vmatprep.subr.bf16.mxu0 %v3539_v26  ;;  %2788 = vmatmul.mubr.bf16.vlgmr.msra.gmra.mrb[4].mxu1 %v1419_v18  ;;  %v3014_v26 = vld [vmem:[#allocation9 + $0x80] ss:$12 sps:$4 sm:$0xff]   ;;  %v1116_v18 = vunpack.c.l.bf16 %v3736_v7 }
 0x1c5   : > { %2807 = vmatprep.mubr.msk.bf16.mxu1 %vm3262_vm0, %v3260_v24  ;;  %2792 = vmatpush3.bf16.msra.mxu1 %v3009_v20  ;;  %v3749_v20 = vrot.slane %v3426_v2, %v3464_v63 }
 0x1c6   : > { %2793 = vmatprep.subr.bf16.mxu1 %v3260_v24 }
 0x1c7   : > { %1885 = vmatpush1.bf16.msra.mxu0 %v3544_v27  ;;  %v3015_v27 = vld [vmem:[#allocation9 + $0x98] ss:$12 sps:$4 sm:$0xff]  }
 0x1c8   : > { %1886 = vmatprep.subr.bf16.mxu0 %v3548_v28  ;;  %v3016_v28 = vld [vmem:[#allocation9 + $0xb0] ss:$12 sps:$4 sm:$0xff]  }
 0x1c9   : > { %2794 = vmatpush3.bf16.msra.mxu1 %v3010_v4 }
 0x1ca   : > { %2795 = vmatprep.subr.bf16.mxu1 %v3260_v24 }
 0x1cb   : > { %1887 = vmatpush1.bf16.msra.mxu0 %v3552_v29  ;;  %v1998_v29 = vld [vmem:[%s1997_s30] sm:$0xff] }
 0x1cc   : > { %1888 = vmatprep.subr.bf16.mxu0 %v3555_v30  ;;  %2273 = vperm.xlu1 %2944, %v1998_v29   ;;  %v2543_v30 = vld [vmem:[%s3615_s10 + $0x8] sm:$0xff] }
 0x1cd   : > { %2796 = vmatpush3.bf16.msra.mxu1 %v3011_v21  ;;  %v1416_v21 = vunpack.c.l.bf16 %v1414_v17 }
 0x1ce   : > { %2797 = vmatprep.subr.bf16.mxu1 %v3260_v24 }
 0x1cf   : > { %1889 = vmatpush1.bf16.msra.mxu0 %v3558_v32  ;;  %v3722_v32 = vrot.slane %v3421_v1, %v3459_v61 }
 0x1d0   : > { %1890 = vmatprep.subr.bf16.mxu0 %v3560_v33  ;;  %1987 = vperm.xlu1 %2944, %v2543_v30   ;;  %v3726_v33 = vrot.slane %v3421_v1, %v3464_v63 }
 0x1d1   : > { %2798 = vmatpush3.bf16.msra.mxu1 %v3012_v13 }
 0x1d2   : > { %2799 = vmatprep.subr.bf16.mxu1 %v3260_v24 }
 0x1d3   : > { %1891 = vmatpush1.bf16.msra.mxu0 %v3564_v35 }
 0x1d4   : > { %1892 = vmatprep.subr.bf16.mxu0 %v3567_v36 }
 0x1d5   : > { %2800 = vmatpush3.bf16.msra.mxu1 %v3013_v15  ;;  %v1417_v15 = vunpack.c.h.bf16 %v1414_v17  ;;  %v3765_v17 = vrot.slane %v3426_v2, %v3472_v5 }
 0x1d6   : > { %2801 = vmatprep.subr.bf16.mxu1 %v3260_v24 }
 0x1d7   : > { %1893 = vmatpush1.bf16.msra.mxu0 %v3572_v38  ;;  %v1115_v38 = vunpack.c.h.bf16 %v1112_v31 }
 0x1d8   : > { %1894 = vmatprep.subr.bf16.mxu0 %v3575_v39 }
 0x1d9   : > { %2802 = vmatpush3.bf16.msra.mxu1 %v3014_v26 }
 0x1da   : > { %2803 = vmatprep.subr.bf16.mxu1 %v3260_v24 }
 0x1db   : > { %1895 = vmatpush1.bf16.msra.mxu0 %v3578_v41 }
 0x1dc   : > { %1896 = vmatprep.subr.bf16.mxu0 %v3582_v42 }
 0x1dd   : > { %2804 = vmatpush3.bf16.msra.mxu1 %v3015_v27 }
 0x1de   : > { %2805 = vmatprep.subr.bf16.mxu1 %v3260_v24 }
 0x1df   : > { %1897 = vmatpush1.bf16.msra.mxu0 %v3591_v44 }
 0x1e0   : > { %2168 = vmatprep.subr.bf16.mxu0 %v3593_v45 }
 0x1e1   : > { %2806 = vmatpush3.bf16.msra.mxu1 %v3016_v28 }
 0x1e2   : > { %2811 = vmatprep.subr.bf16.mxu1 %v3260_v24 }
 0x275   : > { %v1328_v35 = vpop.f32.mrb[0].mxu0 }
 0x276   : > { %v1329_v36 = vadd.f32 %v1328_v35, %v3722_v32  ;;  %v1330_v37 = vpop.f32.mrb[1].mxu0 }
 0x277   : > { %v1331_v39 = vadd.f32 %v1330_v37, %v3726_v33  ;;  %v1332_v40 = vpop.f32.mrb[2].mxu0  ;;  %v1369_v45 = vpop.f32.mrb[0].mxu1 }
 0x278   : > { %v1375_v41 = vadd.f32 %v1329_v36, %v1114_v34  ;;  %v1333_v42 = vpop.f32.mrb[3].mxu0  ;;  %v2769_v47 = vpop.f32.mrb[1].mxu1  ;;  %v1370_v14 = vadd.f32 %v1369_v45, %v3733_v58 }
 0x279   : > { %v1382_v44 = vadd.f32 %v1331_v39, %v1115_v38  ;;  %v1372_v50 = vpop.f32.mrb[2].mxu1  ;;  %v1400_v47 = vpop.permute.xlu0 %1399 }
 0x27a   : > { %v2511_v43 = vmul.f32 -1.442695, %v1375_v41  ;;  %v2770_v53 = vpop.f32.mrb[3].mxu1 }
 0x27b   : > { %v2512_v46 = vmul.f32 -1.442695, %v1382_v44 }
 0x27c   : > { %3025 = vpow2.f32 %v2511_v43 }
 0x27d   : > { %3027 = vpow2.f32 %v2512_v46 }
 0x286   : > { %v3026_v55 = vpop.eup %3025 }
 0x287   : > { %v1379_v57 = vadd.f32 1.0, %v3026_v55  ;;  %v3028_v62 = vpop.eup %3027 }
 0x288   : > { %v1386_v10 = vadd.f32 1.0, %v3028_v62 }
 0x289   : > { %3029 = vrcp.f32 %v1379_v57 }
 0x28a   : > { %3031 = vrcp.f32 %v1386_v10 }
 0x293   : > { %v3030_v3 = vpop.eup %3029 }
 0x294   : > { %v1389_v4 = vmul.f32 %v3030_v3, %v1370_v14  ;;  %v3032_v37 = vpop.eup %3031 }
 0x295   : > { %v1630_v13 = vpop.f32.mrb[4].mxu0  ;;  %v1392_v42 = vsub.f32 1.0, %v3032_v37  ;;  %v1394_v46 = vmul.f32 %v3247_v23, %v3032_v37 }
 0x296   : > { %v1390_v26 = vadd.f32 %v1389_v4, %v1116_v18  ;;  %v1631_v27 = vadd.f32 %v1630_v13, %v3745_v19  ;;  %v1632_v28 = vpop.f32.mrb[5].mxu0  ;;  %v3017_v18 = vld [vmem:[#allocation12 + $0x8] ss:$12 sps:$4 sm:$0xff]  }
 0x297   : > { %v1633_v29 = vadd.f32 %v1632_v28, %v3749_v20  ;;  %v1634_v30 = vpop.f32.mrb[6].mxu0  ;;  %v1671_v38 = vpop.f32.mrb[4].mxu1 }
 0x298   : > { %3033 = vtanh.f32 %v1390_v26  ;;  %v1677_v31 = vadd.f32 %v1631_v27, %v1416_v21  ;;  %v1635_v34 = vpop.f32.mrb[7].mxu0  ;;  %v2789_v40 = vpop.f32.mrb[5].mxu1  ;;  %v1415_v21 = vld [vmem:[%s3739_s29 + $0x8] sm:$0xf] }
 0x299   : > { %v1684_v35 = vadd.f32 %v1633_v29, %v1417_v15  ;;  %v1674_v41 = vpop.f32.mrb[6].mxu1  ;;  %v1672_v15 = vadd.f32 %v1671_v38, %v3765_v17  ;;  %v1418_v26 = vunpack.c.l.bf16 %v1415_v21  ;;  %v3019_v29 = vld [vmem:[#allocation12 + $0x38] ss:$12 sps:$4 sm:$0xff]   ;;  %v1702_v34 = vpop.permute.xlu0 %1701 }
 0x29a   : > { %v2539_v36 = vmul.f32 -1.442695, %v1677_v31  ;;  %v2790_v43 = vpop.f32.mrb[7].mxu1 }
 0x29b   : > { %v2540_v39 = vmul.f32 -1.442695, %v1684_v35 }
 0x29c   : > { %3035 = vpow2.f32 %v2539_v36 }
 0x29d   : > { %3037 = vpow2.f32 %v2540_v39 }
 0x2a2   : > { %v3034_v44 = vpop.eup %3033 }
 0x2a3   : > { %v1393_v45 = vmul.f32 %v3034_v44, %v1392_v42 }
 0x2a5   : > { %v1395_v50 = vadd.f32 %v1394_v46, %v1393_v45 }
 0x2a6   : > { %v3036_v53 = vpop.eup %3035 }
 0x2a7   : > { %v1681_v55 = vadd.f32 1.0, %v3036_v53  ;;  %v1396_v57 = vsub.f32 %v1395_v50, %v3247_v23  ;;  %v1404_v62 = vmul.f32 %v1400_v47, %v1395_v50  ;;  %v3038_v3 = vpop.eup %3037 }
 0x2a8   : > { %v1688_v13 = vadd.f32 1.0, %v3038_v3 }
 0x2a9   : > { %3039 = vrcp.f32 %v1681_v55  ;;  %v1402_v10 = vmul.f32 %v1400_v47, %v1396_v57  ;;  %1406 = vst [vmem:[%s3757_s15] sm:$0xff] %v1404_v62  ;;  %v1720_v62 = vunpack.c.h.bf16 %v3736_v7 }
 0x2aa   : > { %3041 = vrcp.f32 %v1688_v13 }
 0x2ab   : > { %v3761_v14 = vadd.f32 %v3247_v23, %v1402_v10  ;;  %v3018_v23 = vld [vmem:[#allocation12 + $0x20] ss:$12 sps:$4 sm:$0xff]  }
 0x2ad   : > { %v1721_v4 = vpack.c.bf16 %v3761_v14, %v3761_v14 }
 0x2af   : > { %1915 = vmatmul.mubr.bf16.vlgmr.msra.gmra.mrb[8].mxu0 %v1721_v4  ;;  %2808 = vmatmul.mubr.bf16.vlgmr.msra.gmra.mrb[8].mxu1 %v1721_v4 }
 0x2b0   : > { %2169 = vmatpush1.bf16.msra.mxu0 %v3601_v48  ;;  %2812 = vmatpush3.bf16.msra.mxu1 %v3017_v18 }
 0x2b1   : > { %2170 = vmatprep.subr.bf16.mxu0 %v3604_v49  ;;  %2813 = vmatprep.subr.bf16.mxu1 %v3260_v24  ;;  %v3021_v49 = vld [vmem:[#allocation12 + $0x68] ss:$12 sps:$4 sm:$0xff]  }
 0x2b2   : > { %2200 = vmatprep.mubr.bf16.mxu0 %v3261_v25  ;;  %2827 = vmatprep.mubr.msk.bf16.mxu1 %vm3262_vm0, %v3260_v24  ;;  %v3020_v25 = vld [vmem:[#allocation12 + $0x50] ss:$12 sps:$4 sm:$0xff]  }
 0x2b3   : > { %v3040_v27 = vpop.eup %3039 }
 0x2b4   : > { %v1691_v28 = vmul.f32 %v3040_v27, %v1672_v15  ;;  %2171 = vmatpush1.bf16.msra.mxu0 %v3608_v51  ;;  %2814 = vmatpush3.bf16.msra.mxu1 %v3018_v23  ;;  %v3042_v51 = vpop.eup %3041 }
 0x2b5   : > { %2172 = vmatprep.subr.bf16.mxu0 %v3618_v52  ;;  %2815 = vmatprep.subr.bf16.mxu1 %v3260_v24  ;;  %v3022_v52 = vld [vmem:[#allocation12 + $0x80] ss:$12 sps:$4 sm:$0xff]   ;;  %v1696_v30 = vmul.f32 %v3243_v22, %v3042_v51 }
 0x2b6   : > { %v1692_v48 = vadd.f32 %v1691_v28, %v1418_v26 }
 0x2b8   : > { %3043 = vtanh.f32 %v1692_v48  ;;  %2173 = vmatpush1.bf16.msra.mxu0 %v3627_v54  ;;  %2816 = vmatpush3.bf16.msra.mxu1 %v3019_v29  ;;  %v1694_v54 = vsub.f32 1.0, %v3042_v51 }
 0x2b9   : > { %2174 = vmatprep.subr.bf16.mxu0 %v3631_v56  ;;  %2817 = vmatprep.subr.bf16.mxu1 %v3260_v24 }
 0x2bc   : > { %2175 = vmatpush1.bf16.msra.mxu0 %v3635_v59  ;;  %2818 = vmatpush3.bf16.msra.mxu1 %v3020_v25 }
 0x2bd   : > { %2176 = vmatprep.subr.bf16.mxu0 %v3638_v60  ;;  %2819 = vmatprep.subr.bf16.mxu1 %v3260_v24  ;;  %v3023_v60 = vld [vmem:[#allocation12 + $0x98] ss:$12 sps:$4 sm:$0xff]  }
 0x2c0   : > { %2177 = vmatpush1.bf16.msra.mxu0 %v3642_v0  ;;  %2820 = vmatpush3.bf16.msra.mxu1 %v3021_v49 }
 0x2c1   : > { %2178 = vmatprep.subr.bf16.mxu0 %v3647_v6  ;;  %2821 = vmatprep.subr.bf16.mxu1 %v3260_v24  ;;  %v3024_v6 = vld [vmem:[#allocation12 + $0xb0] ss:$12 sps:$4 sm:$0xff]  }
 0x2c2   : > { %v3044_v56 = vpop.eup %3043 }
 0x2c3   : > { %v1695_v59 = vmul.f32 %v3044_v56, %v1694_v54  ;;  %v2274_v56 = vpop.permute.xlu1 %2273 }
 0x2c4   : > { %2179 = vmatpush1.bf16.msra.mxu0 %v3653_v8  ;;  %2822 = vmatpush3.bf16.msra.mxu1 %v3022_v52 }
 0x2c5   : > { %v1697_v31 = vadd.f32 %v1696_v30, %v1695_v59  ;;  %2180 = vmatprep.subr.bf16.mxu0 %v3656_v9  ;;  %2823 = vmatprep.subr.bf16.mxu1 %v3260_v24 }
 0x2c7   : > { %v1698_v0 = vsub.f32 %v1697_v31, %v3243_v22  ;;  %v1988_v31 = vpop.permute.xlu1 %1987 }
 0x2c8   : > { %2181 = vmatpush1.bf16.msra.mxu0 %v3660_v11  ;;  %2824 = vmatpush3.bf16.msra.mxu1 %v3023_v60  ;;  %v2546_v11 = vld [vmem:[%s3717_s23 + $0xc] sm:$0xff] }
 0x2c9   : > { %2182 = vmatprep.subr.bf16.mxu0 %v3663_v12  ;;  %2825 = vmatprep.subr.bf16.mxu1 %v3260_v24  ;;  %v1704_v8 = vmul.f32 %v1702_v34, %v1698_v0  ;;  %v1718_v12 = vunpack.c.l.bf16 %v2546_v11 }
 0x2cb   : > { %v3798_v35 = vadd.f32 %v3243_v22, %v1704_v8 }
 0x2cc   : > { %2183 = vmatpush1.bf16.msra.mxu0 %v3667_v16  ;;  %2826 = vmatpush3.bf16.msra.mxu1 %v3024_v6  ;;  %v1719_v16 = vunpack.c.h.bf16 %v2546_v11 }
 0x2cd   : > { %v2007_v9 = vpack.c.bf16 %v3798_v35, %v3798_v35  ;;  %v1706_v36 = vmul.f32 %v3798_v35, %v1702_v34 }
 0x2cf   : > { %2201 = vmatmul.mubr.bf16.vlgmr.msra.gmra.mrb[12].mxu0 %v2007_v9  ;;  %2828 = vmatmul.mubr.bf16.vlgmr.msra.gmra.mrb[12].mxu1 %v2007_v9  ;;  %1708 = vst [vmem:[%s1707_s17] sm:$0xff] %v1706_v36 }
 0x382   : > { %v1916_v24 = vpop.f32.mrb[8].mxu0  ;;  %v1957_v37 = vpop.f32.mrb[8].mxu1 }
 0x383   : > { %v1917_v22 = vadd.f32 %v1916_v24, %v3722_v32  ;;  %v1918_v38 = vpop.f32.mrb[9].mxu0  ;;  %v2809_v39 = vpop.f32.mrb[9].mxu1  ;;  %v1958_v10 = vadd.f32 %v1957_v37, %v3733_v58  ;;  %v2003_v24 = vld [vmem:[%s3810_s8 + $0x8] sm:$0xf] }
 0x384   : > { %v1919_v40 = vadd.f32 %v1918_v38, %v3726_v33  ;;  %v1920_v41 = vpop.f32.mrb[10].mxu0  ;;  %v1960_v42 = vpop.f32.mrb[10].mxu1  ;;  %v2002_v33 = vld [vmem:[%s3810_s8] sm:$0xff] }
 0x385   : > { %v1963_v43 = vadd.f32 %v1917_v22, %v1718_v12  ;;  %v1921_v44 = vpop.f32.mrb[11].mxu0  ;;  %v2810_v45 = vpop.f32.mrb[11].mxu1  ;;  %v2004_v4 = vunpack.c.l.bf16 %v2002_v33  ;;  %v2005_v15 = vunpack.c.h.bf16 %v2002_v33  ;;  %v2006_v22 = vunpack.c.l.bf16 %v2003_v24 }
 0x386   : > { %v1970_v47 = vadd.f32 %v1919_v40, %v1719_v16 }
 0x387   : > { %v2572_v46 = vmul.f32 -1.442695, %v1963_v43 }
 0x388   : > { %v2573_v50 = vmul.f32 -1.442695, %v1970_v47 }
 0x389   : > { %3045 = vpow2.f32 %v2572_v46 }
 0x38a   : > { %3047 = vpow2.f32 %v2573_v50 }
 0x393   : > { %v3046_v53 = vpop.eup %3045 }
 0x394   : > { %v1967_v55 = vadd.f32 1.0, %v3046_v53  ;;  %v3048_v32 = vpop.eup %3047 }
 0x395   : > { %v1974_v57 = vadd.f32 1.0, %v3048_v32 }
 0x396   : > { %3049 = vrcp.f32 %v1967_v55 }
 0x397   : > { %3051 = vrcp.f32 %v1974_v57 }
 0x3a0   : > { %v3050_v18 = vpop.eup %3049 }
 0x3a1   : > { %v1977_v3 = vmul.f32 %v3050_v18, %v1958_v10  ;;  %v3052_v54 = vpop.eup %3051 }
 0x3a2   : > { %v2202_v21 = vpop.f32.mrb[12].mxu0  ;;  %v2243_v13 = vpop.f32.mrb[12].mxu1  ;;  %v1980_v59 = vsub.f32 1.0, %v3052_v54 }
 0x3a3   : > { %v1978_v23 = vadd.f32 %v1977_v3, %v1720_v62  ;;  %v2203_v26 = vadd.f32 %v2202_v21, %v3745_v19  ;;  %v2204_v27 = vpop.f32.mrb[13].mxu0  ;;  %v2829_v28 = vpop.f32.mrb[13].mxu1  ;;  %v2244_v38 = vadd.f32 %v2243_v13, %v3765_v17 }
 0x3a4   : > { %v2205_v29 = vadd.f32 %v2204_v27, %v3749_v20  ;;  %v2206_v48 = vpop.f32.mrb[14].mxu0  ;;  %v2246_v25 = vpop.f32.mrb[14].mxu1  ;;  %v1982_v20 = vmul.f32 %v3052_v54, %v3761_v14 }
 0x3a5   : > { %3053 = vtanh.f32 %v1978_v23  ;;  %v2249_v7 = vadd.f32 %v2203_v26, %v2004_v4  ;;  %v2207_v49 = vpop.f32.mrb[15].mxu0  ;;  %v2830_v58 = vpop.f32.mrb[15].mxu1 }
 0x3a6   : > { %v2256_v51 = vadd.f32 %v2205_v29, %v2005_v15 }
 0x3a7   : > { %v2603_v52 = vmul.f32 -1.442695, %v2249_v7 }
 0x3a8   : > { %v2604_v30 = vmul.f32 -1.442695, %v2256_v51 }
 0x3a9   : > { %3055 = vpow2.f32 %v2603_v52 }
 0x3aa   : > { %3057 = vpow2.f32 %v2604_v30 }
 0x3af   : > { %v3054_v19 = vpop.eup %3053 }
 0x3b0   : > { %v1981_v60 = vmul.f32 %v3054_v19, %v1980_v59 }
 0x3b2   : > { %v1983_v0 = vadd.f32 %v1982_v20, %v1981_v60 }
 0x3b3   : > { %v3056_v34 = vpop.eup %3055 }
 0x3b4   : > { %v2253_v6 = vadd.f32 1.0, %v3056_v34  ;;  %v1984_v8 = vsub.f32 %v1983_v0, %v3761_v14  ;;  %v1992_v9 = vmul.f32 %v1988_v31, %v1983_v0  ;;  %v3058_v12 = vpop.eup %3057 }
 0x3b5   : > { %v2260_v37 = vadd.f32 1.0, %v3058_v12 }
 0x3b6   : > { %3059 = vrcp.f32 %v2253_v6  ;;  %v1990_v36 = vmul.f32 %v1988_v31, %v1984_v8  ;;  %2576 = vst [vmem:[%s3757_s15 + $0x8] sm:$0xff] %v1992_v9 }
 0x3b7   : > { %3061 = vrcp.f32 %v2260_v37 }
 0x3b8   : > { %v1991_v11 = vadd.f32 %v1990_v36, %v3761_v14  }
 0x3ba   : > { %v3894_v23 = vmov %v1991_v11  ;;  %2286 = vst [vmem:[#allocation17] sm:$0xff] (%p1099_p4), %v1991_v11 }
 0x3c0   : > { %v3060_v39 = vpop.eup %3059 }
 0x3c1   : > { %v2263_v16 = vmul.f32 %v3060_v39, %v2244_v38  ;;  %v3062_v41 = vpop.eup %3061 }
 0x3c2   : > { %v2266_v42 = vsub.f32 1.0, %v3062_v41  ;;  %v2268_v45 = vmul.f32 %v3062_v41, %v3798_v35 }
 0x3c3   : > { %v2264_v40 = vadd.f32 %v2263_v16, %v2006_v22 }
 0x3c5   : > { %3063 = vtanh.f32 %v2264_v40 }
 0x3cf   : > { %v3064_v43 = vpop.eup %3063 }
 0x3d0   : > { %v2267_v44 = vmul.f32 %v3064_v43, %v2266_v42 }
 0x3d2   : > { %v2269_v46 = vadd.f32 %v2268_v45, %v2267_v44 }
 0x3d4   : > { %v2270_v14 = vsub.f32 %v2269_v46, %v3798_v35 }
 0x3d6   : > { %v2276_v47 = vmul.f32 %v2274_v56, %v2270_v14  ;;  %1101 = sbr.rel (!%p1099_p4) target bundleno = 384 (0x180), region = 136 }
 0x3d8   : > { %v2277_v50 = vadd.f32 %v2276_v47, %v3798_v35  }
 0x3da   : > { %v2278_v53 = vmul.f32 %v2277_v50, %v2274_v56  ;;  %v3893_v22 = vmov %v2277_v50  ;;  %2287 = vst [vmem:[#allocation17 + $0x8] sm:$0xff] (%p1099_p4), %v2277_v50 }
 0x3dc   : > { %2280 = vst [vmem:[%s2279_s1] sm:$0xff] %v2278_v53 }
 0x3dd   :  { %3164 = shalt.err (!%p3161_p9)
}
 0x3de   :  { %s3165_s9 = scalar_lea.hbm %s3891_s13, 1024 }
 0x3df   :  { %p3166_p10 = scmp.ne.s32.totalorder %s3891_s13, %s3165_s9  ;;  %p3169_p11 = scmp.lt.u32.totalorder %s3165_s9, %s3891_s13 }
 0x3e1   :  { %p3171_p12 = pnand %p3169_p11, %p3166_p10 }
 0x3e3   :  { %3174 = shalt.err (!%p3171_p12)
}
 0x3e4   :  { %s3265_s25 = smov 128   ;;  %s3266_s26 = smov 8  }
 0x3e5   :  { %2315 = dma.vmem_to_hbm [thread:$0]  %s2310_s24, 1024, %s3891_s13, [#allocation16], %s3265_s25, %s3265_s25, %s3266_s26  }
 0x3e6   :  { %s3175_s22 = scalar_lea.vmem %s3835_s20, 1024  ;;  %p3180_p0 = scmp.lt.s32.totalorder %s3835_s20, %s3835_s20 }
 0x3e7   :  { %p3176_p13 = scmp.ne.s32.totalorder %s3835_s20, %s3175_s22  ;;  %p3181_p1 = scmp.lt.s32.totalorder %s3175_s22, %s3175_s22 }
 0x3e9   :  { %p3182_p2 = por %p3181_p1, %p3180_p0 }
 0x3eb   :  { %p3183_p3 = pnand %p3182_p2, %p3176_p13 }
 0x3ed   :  { %3186 = shalt.err (!%p3183_p3)
}
 0x3ee   :  { %s3187_s0 = scalar_lea.hbm %s3890_s12, 1024 }
 0x3ef   :  { %p3188_p4 = scmp.ne.s32.totalorder %s3890_s12, %s3187_s0  ;;  %p3191_p5 = scmp.lt.u32.totalorder %s3187_s0, %s3890_s12 }
 0x3f1   :  { %p3193_p6 = pnand %p3191_p5, %p3188_p4 }
 0x3f3   :  { %3196 = shalt.err (!%p3193_p6)
}
 0x3f4   :  { %2299 = dma.vmem_to_hbm [thread:$0]  %s3835_s20, 1024, %s3890_s12, [#allocation8], %s3265_s25, %s3265_s25, %s3266_s26  }
 0x3f5   :  { %s3267_s18 = smov [#allocation17]  }
 0x3f6   :  { %s2322_s8 = sshll.u32 %s3267_s18, 4  ;;  %s2323_s8 = int_to_ptr.vmem [resolvable:$true] %s2322_s8 }
 0x3f7   :  { %s3197_s1 = scalar_lea.vmem %s2323_s8, 256  ;;  %p3202_p8 = scmp.lt.s32.totalorder %s2323_s8, %s2323_s8 }
 0x3f8   :  { %p3198_p7 = scmp.ne.s32.totalorder %s2323_s8, %s3197_s1  ;;  %p3203_p9 = scmp.lt.s32.totalorder %s3197_s1, %s3197_s1 }
 0x3fa   :  { %p3204_p10 = por %p3203_p9, %p3202_p8 }
 0x3fc   :  { %p3205_p11 = pnand %p3204_p10, %p3198_p7 }
 0x3fe   :  { %3208 = shalt.err (!%p3205_p11)
}
 0x3ff   :  { %s3209_s19 = scalar_lea.hbm %s3892_s14, 256 }
 0x400   :  { %p3210_p12 = scmp.ne.s32.totalorder %s3892_s14, %s3209_s19  ;;  %p3213_p13 = scmp.lt.u32.totalorder %s3209_s19, %s3892_s14 }
 0x402   :  { %p3215_p0 = pnand %p3213_p13, %p3210_p12 }
 0x404   :  { %3218 = shalt.err (!%p3215_p0)
}
 0x405   :  { %2325 = dma.vmem_to_hbm [thread:$0]  %s2323_s8, 256, %s3892_s14, [#allocation16]  }
 0x406   :  { %3237 = dma.done.wait [#allocation8], 1024  }
 0x407   :  { %3238 = vsyncadd [#allocation8], 4294966272 }
 0x408   :  { %3239 = dma.done.wait [#allocation16], 1280  }
 0x409   :  { %3240 = vsyncadd [#allocation16], 4294966016 }
 0x40a   :  { %2335 = vsyncpa [#allocation7], 1 }
 0x40b   :  { %2336 = vsyncpa [#allocation10], 1 }
 0x40c   :  { %2337 = vsyncpa [#allocation13], 1 }
 0x40d   :  { %2338 = vsyncpa [#allocation8], 1 }
 0x40e   :  { %2339 = vsyncpa [#allocation16], 1 }

</bundles_post_ra>
